<compile_context>
chip_gen: v5e
topology: v5e:2x2
jax: 0.10.0
libtpu: 0.0.40
codegen_flags: <defaults>
</compile_context>

<pallas_src>
import math
from functools import partial

import jax
import jax.numpy as jnp
from jax import lax
from jax.experimental import pallas as pl
from jax.experimental.pallas import tpu as pltpu

NEG_INF = -1e9          # additive padding-mask value (PyTorch bool mask -> -inf)
_INV_SQRT2 = 0.7071067811865476

# contract last dims of both operands: A (m,k) x B (n,k) -> (m,n)  (no k.T)
_NT_DIMS = (((1,), (1,)), ((), ()))


# ----------------------------------------------------------------------------
# In-kernel helpers (pure jnp, traced inside the Pallas kernel)
# ----------------------------------------------------------------------------
def _erf_approx(x):
    # Abramowitz & Stegun 7.1.26 rational approximation, |err| <= 1.5e-7.
    # TODO(synk): tanh-approx GELU (EUP) if the FFN path ever shows VALU-bound.
    a1, a2, a3, a4, a5 = 0.254829592, -0.284496736, 1.421413741, -1.453152027, 1.061405429
    p_c = 0.3275911
    sgn = jnp.where(x >= 0.0, 1.0, -1.0)
    ax = jnp.abs(x)
    t = 1.0 / (1.0 + p_c * ax)
    poly = ((((a5 * t + a4) * t + a3) * t + a2) * t + a1) * t
    return sgn * (1.0 - poly * jnp.exp(-ax * ax))


def _gelu_exact(x):
    # matches nn.GELU() (erf-based) up to ~1e-7
    return 0.5 * x * (1.0 + _erf_approx(x * _INV_SQRT2))


def _layer_norm(x, g, b, eps):
    mean = jnp.mean(x, axis=-1, keepdims=True)
    var = jnp.mean(jnp.square(x - mean), axis=-1, keepdims=True)
    return (x - mean) * lax.rsqrt(var + eps) * g + b


# ----------------------------------------------------------------------------
# Fused encoder-layer kernel (one grid step == TB batch elements)
# ----------------------------------------------------------------------------
def _encoder_layer_kernel(eps, n_heads, apply_residual, use_layer_norm, use_gelu,
                          mask_ref, x_ref,
                          wqkv_ref, bqkv_ref, wo_ref, bo_ref,
                          g1_ref, be1_ref,
                          w1_ref, b1_ref, w2_ref, b2_ref,
                          g2_ref, be2_ref,
                          o_ref,
                          ctx_ref):
    TB, S, D = x_ref.shape
    hd = D // n_heads
    scale = 1.0 / math.sqrt(hd)

    # flatten the batch block -> larger MXU M dim (layout-preserving reshape)
    x2d = x_ref[...].reshape(TB * S, D)                       # (TB*S, D) f32
    x_b16 = x2d.astype(jnp.bfloat16)

    # ---- fused QKV projection (bf16 MXU inputs, f32 accumulation) -------------
    qkv = jnp.dot(x_b16, wqkv_ref[...],
                  preferred_element_type=jnp.float32) + bqkv_ref[...]   # (TB*S, 3D)

    # fold softmax scale into Q once, cast Q/K/V to bf16 exactly once
    q_b16 = (qkv[:, :D] * scale).astype(jnp.bfloat16)
    k_b16 = qkv[:, D:2 * D].astype(jnp.bfloat16)
    v_b16 = qkv[:, 2 * D:].astype(jnp.bfloat16)

    # ---- multi-head self attention --------------------------------------------
    # TODO(synk): lane-dense / batched-head dot_general once hd >= 128; at the
    # demo hd=8 a static unrolled loop writing into the VMEM ctx slab is used.
    for b in range(TB):                       # static unroll over batch elements
        r0 = b * S
        # hoist the (1,S)->(S,S) mask broadcast out of the head loop
        mask2d = jnp.broadcast_to(mask_ref[b], (S, S))        # f32 additive mask
        for h in range(n_heads):              # static unroll over heads
            c0 = h * hd
            q = q_b16[r0:r0 + S, c0:c0 + hd]
            k = k_b16[r0:r0 + S, c0:c0 + hd]
            v = v_b16[r0:r0 + S, c0:c0 + hd]
            # NT matmul: contract last dims directly (no materialized k.T)
            s = lax.dot_general(q, k, _NT_DIMS,
                                preferred_element_type=jnp.float32)
            s = s + mask2d
            s = s - jnp.max(s, axis=-1, keepdims=True)
            p = jnp.exp(s)
            p = p * pl.reciprocal(jnp.sum(p, axis=-1, keepdims=True), approx=True)
            ctx_ref[r0:r0 + S, c0:c0 + hd] = jnp.dot(
                p.astype(jnp.bfloat16), v, preferred_element_type=jnp.float32)

    ctx = ctx_ref[...]                                        # (TB*S, D) f32

    # ---- out projection + (dropout=id) + residual + LayerNorm -----------------
    attn = jnp.dot(ctx.astype(jnp.bfloat16), wo_ref[...],
                   preferred_element_type=jnp.float32) + bo_ref[...]
    h1 = x2d + attn if apply_residual else attn
    if use_layer_norm:
        h1 = _layer_norm(h1, g1_ref[...], be1_ref[...], eps)

    # ---- FFN: matmul + GELU + matmul + (dropout=id) + residual + LayerNorm ----
    f = jnp.dot(h1.astype(jnp.bfloat16), w1_ref[...],
                preferred_element_type=jnp.float32) + b1_ref[...]      # (TB*S, F)
    f = _gelu_exact(f) if use_gelu else jnp.maximum(f, 0.0)
    f = jnp.dot(f.astype(jnp.bfloat16), w2_ref[...],
                preferred_element_type=jnp.float32) + b2_ref[...]      # (TB*S, D)
    h2 = h1 + f if apply_residual else f
    if use_layer_norm:
        h2 = _layer_norm(h2, g2_ref[...], be2_ref[...], eps)

    o_ref[...] = h2.reshape(TB, S, D)


def _pick_batch_block(B, S, max_rows=512):
    """Largest divisor of B such that TB*S stays a modest VMEM/vreg footprint."""
    tb = 1
    for cand in range(1, B + 1):
        if B % cand == 0 and cand * S <= max_rows:
            tb = cand
    return tb


def encoder_layer_forward(params, cfg, src, src_key_padding_mask=None,
                          batch_block=None):
    """src: (B, S, D) f32; src_key_padding_mask: (B, S) bool (True = ignore)."""
    B, S, D = src.shape
    F = cfg["ffn_dim"]

    if src_key_padding_mask is None:
        mask_add = jnp.zeros((B, 1, S), jnp.float32)
    else:
        mask_add = jnp.where(src_key_padding_mask, NEG_INF, 0.0).astype(
            jnp.float32).reshape(B, 1, S)

    tb = batch_block if batch_block is not None else _pick_batch_block(B, S)
    assert B % tb == 0, "batch block must divide batch size"

    # bf16 weights at the call boundary: halves weight DMA bytes and resident
    # VMEM (essential headroom for v7x's 64 MiB); accumulation stays f32.
    wqkv = params["wqkv"].astype(jnp.bfloat16)
    wo = params["wo"].astype(jnp.bfloat16)
    w1 = params["w1"].astype(jnp.bfloat16)
    w2 = params["w2"].astype(jnp.bfloat16)

    kernel = partial(
        _encoder_layer_kernel,
        cfg["norm_eps"],
        cfg["n_heads"],
        bool(cfg["apply_residual"]),
        cfg["normalization_type"] == "layer_norm",
        cfg["activation"] == "gelu",
    )

    # Explicit VMEM budget derived from the actual block sizes (instead of the
    # default scoped limit): bf16 weights + f32 biases/LN/mask + activations,
    # x2 for double buffering, clamped to 64 MiB (safe on v5e/v6e/v7x).
    weight_bytes = 2 * (D * 3 * D + D * D + D * F + F * D)
    small_bytes = 4 * (3 * D + 6 * D + F + tb * S)
    act_bytes = 4 * tb * S * (D + 3 * D + D + F + D + D)
    vmem_limit = int(min(64 * 1024 * 1024,
                         max(16 * 1024 * 1024,
                             2 * (weight_bytes + small_bytes + act_bytes))))

    full2d = lambda i: (0, 0)                  # weights: same block every step
    return pl.pallas_call(
        kernel,
        grid=(B // tb,),
        out_shape=jax.ShapeDtypeStruct((B, S, D), jnp.float32),
        in_specs=[
            pl.BlockSpec((tb, 1, S), lambda i: (i, 0, 0)),     # additive pad mask
            pl.BlockSpec((tb, S, D), lambda i: (i, 0, 0)),     # src
            # TODO(synk): for large D/F mark these constant-index weight specs
            # pipeline_mode=pl.Buffered(1) (no point double-buffering a block
            # whose index never changes) or tile w1/w2 over F.
            pl.BlockSpec((D, 3 * D), full2d),                  # wqkv (bf16)
            pl.BlockSpec((1, 3 * D), full2d),                  # bqkv
            pl.BlockSpec((D, D), full2d),                      # wo (bf16)
            pl.BlockSpec((1, D), full2d),                      # bo
            pl.BlockSpec((1, D), full2d),                      # ln1 gamma
            pl.BlockSpec((1, D), full2d),                      # ln1 beta
            pl.BlockSpec((D, F), full2d),                      # ffn w1 (bf16)
            pl.BlockSpec((1, F), full2d),                      # ffn b1
            pl.BlockSpec((F, D), full2d),                      # ffn w2 (bf16)
            pl.BlockSpec((1, D), full2d),                      # ffn b2
            pl.BlockSpec((1, D), full2d),                      # ln2 gamma
            pl.BlockSpec((1, D), full2d),                      # ln2 beta
        ],
        out_specs=pl.BlockSpec((tb, S, D), lambda i: (i, 0, 0)),
        scratch_shapes=[pltpu.VMEM((tb * S, D), jnp.float32)],  # attention ctx slab
        compiler_params=pltpu.CompilerParams(
            dimension_semantics=("parallel",),                  # megacore-friendly
            vmem_limit_bytes=vmem_limit),
    )(mask_add, src,
      wqkv, params["bqkv"], wo, params["bo"],
      params["g1"], params["be1"],
      w1, params["b1"], w2, params["b2"],
      params["g2"], params["be2"])


# ----------------------------------------------------------------------------
# Pure-JAX reference (f32, exact gelu) for a sanity check
# ----------------------------------------------------------------------------
def encoder_layer_ref(params, cfg, src, pad_mask):
    B, S, D = src.shape
    H = cfg["n_heads"]
    hd = D // H
    eps = cfg["norm_eps"]

    def ln(x, g, b):
        m = jnp.mean(x, -1, keepdims=True)
        v = jnp.mean(jnp.square(x - m), -1, keepdims=True)
        return (x - m) / jnp.sqrt(v + eps) * g + b

    qkv = src @ params["wqkv"] + params["bqkv"]
    q, k, v = jnp.split(qkv, 3, axis=-1)
    to_h = lambda t: t.reshape(B, S, H, hd).transpose(0, 2, 1, 3)
    q, k, v = to_h(q), to_h(k), to_h(v)
    s = jnp.einsum("bhqd,bhkd->bhqk", q, k) / math.sqrt(hd)
    s = s + jnp.where(pad_mask, NEG_INF, 0.0)[:, None, None, :]
    p = jax.nn.softmax(s, axis=-1)
    ctx = jnp.einsum("bhqk,bhkd->bhqd", p, v).transpose(0, 2, 1, 3).reshape(B, S, D)
    attn = ctx @ params["wo"] + params["bo"]
    h1 = ln(src + attn, params["g1"], params["be1"])
    f = jax.nn.gelu(h1 @ params["w1"] + params["b1"], approximate=False)
    f = f @ params["w2"] + params["b2"]
    return ln(h1 + f, params["g2"], params["be2"])


# ----------------------------------------------------------------------------
# Deterministic parameter init (weights stored (in_features, out_features))
# ----------------------------------------------------------------------------
def init_params(key, cfg):
    D, F = cfg["d_model"], cfg["ffn_dim"]
    ks = jax.random.split(key, 8)
    bd = 1.0 / math.sqrt(D)
    bf = 1.0 / math.sqrt(F)
    u = lambda k, shape, b: jax.random.uniform(k, shape, jnp.float32, -b, b)
    return {
        "wqkv": u(ks[0], (D, 3 * D), bd),
        "bqkv": jnp.zeros((1, 3 * D), jnp.float32),
        "wo": u(ks[1], (D, D), bd),
        "bo": u(ks[2], (1, D), bd),
        "g1": jnp.ones((1, D), jnp.float32),
        "be1": jnp.zeros((1, D), jnp.float32),
        "w1": u(ks[3], (D, F), bd),
        "b1": u(ks[4], (1, F), bd),
        "w2": u(ks[5], (F, D), bf),
        "b2": u(ks[6], (1, D), bf),
        "g2": jnp.ones((1, D), jnp.float32),
        "be2": jnp.zeros((1, D), jnp.float32),
    }


# ----------------------------------------------------------------------------
if __name__ == "__main__":
    cfg = {
        "d_model": 32,
        "n_heads": 4,
        "ffn_dim": 64,
        "norm_eps": 1e-5,
        "apply_residual": True,
        "normalization_type": "layer_norm",
        "activation": "gelu",
    }
    B, S = 2, 8

    root = jax.random.PRNGKey(0)
    k_params, k_src = jax.random.split(root)
    params = init_params(k_params, cfg)

    src = jax.random.normal(k_src, (B, S, cfg["d_model"]), jnp.float32)
    # mark the last two tokens of batch element 1 as padding (True = ignore)
    src_key_padding_mask = jnp.zeros((B, S), bool).at[1, -2:].set(True)

    out = encoder_layer_forward(params, cfg, src, src_key_padding_mask)
    out = jax.block_until_ready(out)

    assert out.shape == (B, S, cfg["d_model"])
    assert bool(jnp.all(jnp.isfinite(out)))

    ref = encoder_layer_ref(params, cfg, src, src_key_padding_mask)
    max_err = float(jnp.max(jnp.abs(out - ref)))
    assert max_err < 1e-1, f"mismatch vs f32 reference: {max_err}"

    print("KERNEL_OK")
</pallas_src>

<mosaic_0001>
module attributes {stable_mosaic.version = 11 : i64} {
  func.func @_encoder_layer_kernel(%arg0: i32, %arg1: memref<2x1x8xf32, #tpu.memory_space<vmem>>, %arg2: memref<2x8x32xf32, #tpu.memory_space<vmem>>, %arg3: memref<32x96xbf16, #tpu.memory_space<vmem>>, %arg4: memref<1x96xf32, #tpu.memory_space<vmem>>, %arg5: memref<32x32xbf16, #tpu.memory_space<vmem>>, %arg6: memref<1x32xf32, #tpu.memory_space<vmem>>, %arg7: memref<1x32xf32, #tpu.memory_space<vmem>>, %arg8: memref<1x32xf32, #tpu.memory_space<vmem>>, %arg9: memref<32x64xbf16, #tpu.memory_space<vmem>>, %arg10: memref<1x64xf32, #tpu.memory_space<vmem>>, %arg11: memref<64x32xbf16, #tpu.memory_space<vmem>>, %arg12: memref<1x32xf32, #tpu.memory_space<vmem>>, %arg13: memref<1x32xf32, #tpu.memory_space<vmem>>, %arg14: memref<1x32xf32, #tpu.memory_space<vmem>>, %arg15: memref<2x8x32xf32, #tpu.memory_space<vmem>>, %arg16: memref<16x32xf32, #tpu.memory_space<vmem>>) attributes {dimension_semantics = [#tpu.dimension_semantics<parallel>], iteration_bounds = array<i64: 1>, scalar_prefetch = 0 : i64, scratch_operands = 1 : i64, tpu.core_type = #tpu.core_type<tc>, window_params = [{transform_indices = @transform_0, window_bounds = array<i64: 2, 1, 8>}, {transform_indices = @transform_1, window_bounds = array<i64: 2, 8, 32>}, {pipeline_mode = #tpu.pipeline_mode<synchronous>, transform_indices = @transform_2, window_bounds = array<i64: 32, 96>}, {pipeline_mode = #tpu.pipeline_mode<synchronous>, transform_indices = @transform_3, window_bounds = array<i64: 1, 96>}, {pipeline_mode = #tpu.pipeline_mode<synchronous>, transform_indices = @transform_4, window_bounds = array<i64: 32, 32>}, {pipeline_mode = #tpu.pipeline_mode<synchronous>, transform_indices = @transform_5, window_bounds = array<i64: 1, 32>}, {pipeline_mode = #tpu.pipeline_mode<synchronous>, transform_indices = @transform_6, window_bounds = array<i64: 1, 32>}, {pipeline_mode = #tpu.pipeline_mode<synchronous>, transform_indices = @transform_7, window_bounds = array<i64: 1, 32>}, {pipeline_mode = #tpu.pipeline_mode<synchronous>, transform_indices = @transform_8, window_bounds = array<i64: 32, 64>}, {pipeline_mode = #tpu.pipeline_mode<synchronous>, transform_indices = @transform_9, window_bounds = array<i64: 1, 64>}, {pipeline_mode = #tpu.pipeline_mode<synchronous>, transform_indices = @transform_10, window_bounds = array<i64: 64, 32>}, {pipeline_mode = #tpu.pipeline_mode<synchronous>, transform_indices = @transform_11, window_bounds = array<i64: 1, 32>}, {pipeline_mode = #tpu.pipeline_mode<synchronous>, transform_indices = @transform_12, window_bounds = array<i64: 1, 32>}, {pipeline_mode = #tpu.pipeline_mode<synchronous>, transform_indices = @transform_13, window_bounds = array<i64: 1, 32>}, {transform_indices = @transform_14, window_bounds = array<i64: 2, 8, 32>}]} {
    %c0 = arith.constant 0 : index
    %c0_0 = arith.constant 0 : index
    %c0_1 = arith.constant 0 : index
    %0 = vector.load %arg2[%c0, %c0_0, %c0_1] : memref<2x8x32xf32, #tpu.memory_space<vmem>>, vector<2x8x32xf32>
    %1 = vector.shape_cast %0 : vector<2x8x32xf32> to vector<16x32xf32>
    %2 = arith.truncf %1 : vector<16x32xf32> to vector<16x32xbf16>
    %c0_2 = arith.constant 0 : index
    %c0_3 = arith.constant 0 : index
    %3 = vector.load %arg3[%c0_2, %c0_3] : memref<32x96xbf16, #tpu.memory_space<vmem>>, vector<32x96xbf16>
    %cst = arith.constant dense<0.000000e+00> : vector<16x96xf32>
    %4 = tpu.matmul %2, %3, %cst {dimension_numbers = #tpu.dot_dimension_numbers<[1], [0], [0], [1], [0, 0, 1, 1], [], []>} : vector<16x32xbf16>, vector<32x96xbf16>, vector<16x96xf32> -> vector<16x96xf32>
    %c0_4 = arith.constant 0 : index
    %c0_5 = arith.constant 0 : index
    %5 = vector.load %arg4[%c0_4, %c0_5] : memref<1x96xf32, #tpu.memory_space<vmem>>, vector<1x96xf32>
    %6 = vector.broadcast %5 : vector<1x96xf32> to vector<16x96xf32>
    %7 = arith.addf %4, %6 : vector<16x96xf32>
    %8 = vector.extract_strided_slice %7 {offsets = [0, 0], sizes = [16, 32], strides = [1, 1]} : vector<16x96xf32> to vector<16x32xf32>
    %cst_6 = arith.constant 0.353553385 : f32
    %9 = vector.broadcast %cst_6 : f32 to vector<16x32xf32>
    %10 = arith.mulf %8, %9 : vector<16x32xf32>
    %11 = arith.truncf %10 : vector<16x32xf32> to vector<16x32xbf16>
    %12 = vector.extract_strided_slice %7 {offsets = [0, 32], sizes = [16, 32], strides = [1, 1]} : vector<16x96xf32> to vector<16x32xf32>
    %13 = arith.truncf %12 : vector<16x32xf32> to vector<16x32xbf16>
    %14 = vector.extract_strided_slice %7 {offsets = [0, 64], sizes = [16, 32], strides = [1, 1]} : vector<16x96xf32> to vector<16x32xf32>
    %15 = arith.truncf %14 : vector<16x32xf32> to vector<16x32xbf16>
    %c0_7 = arith.constant 0 : index
    %c0_8 = arith.constant 0 : index
    %c0_9 = arith.constant 0 : index
    %16 = vector.load %arg1[%c0_7, %c0_8, %c0_9] : memref<2x1x8xf32, #tpu.memory_space<vmem>>, vector<1x1x8xf32>
    %17 = vector.shape_cast %16 : vector<1x1x8xf32> to vector<1x8xf32>
    %18 = vector.shape_cast %17 : vector<1x8xf32> to vector<1x8xf32>
    %19 = vector.broadcast %18 : vector<1x8xf32> to vector<8x8xf32>
    %20 = vector.extract_strided_slice %11 {offsets = [0, 0], sizes = [8, 8], strides = [1, 1]} : vector<16x32xbf16> to vector<8x8xbf16>
    %21 = vector.extract_strided_slice %13 {offsets = [0, 0], sizes = [8, 8], strides = [1, 1]} : vector<16x32xbf16> to vector<8x8xbf16>
    %22 = vector.extract_strided_slice %15 {offsets = [0, 0], sizes = [8, 8], strides = [1, 1]} : vector<16x32xbf16> to vector<8x8xbf16>
    %cst_10 = arith.constant dense<0.000000e+00> : vector<8x8xf32>
    %23 = tpu.matmul %20, %21, %cst_10 {dimension_numbers = #tpu.dot_dimension_numbers<[1], [1], [0], [0], [0, 0, 1, 0], [], []>} : vector<8x8xbf16>, vector<8x8xbf16>, vector<8x8xf32> -> vector<8x8xf32>
    %24 = arith.addf %23, %19 : vector<8x8xf32>
    %cst_11 = arith.constant dense<0xFF800000> : vector<8xf32>
    %25 = vector.multi_reduction <maximumf>, %24, %cst_11 [1] : vector<8x8xf32> to vector<8xf32>
    %26 = vector.shape_cast %25 : vector<8xf32> to vector<8x1xf32>
    %27 = vector.broadcast %26 : vector<8x1xf32> to vector<8x8xf32>
    %28 = arith.subf %24, %27 : vector<8x8xf32>
    %29 = math.exp %28 : vector<8x8xf32>
    %cst_12 = arith.constant dense<0.000000e+00> : vector<8xf32>
    %30 = vector.multi_reduction <add>, %29, %cst_12 [1] : vector<8x8xf32> to vector<8xf32>
    %31 = vector.shape_cast %30 : vector<8xf32> to vector<8x1xf32>
    %32 = tpu.reciprocal %31 {approx = true} : vector<8x1xf32> -> vector<8x1xf32>
    %33 = vector.broadcast %32 : vector<8x1xf32> to vector<8x8xf32>
    %34 = arith.mulf %29, %33 : vector<8x8xf32>
    %35 = arith.truncf %34 : vector<8x8xf32> to vector<8x8xbf16>
    %cst_13 = arith.constant dense<0.000000e+00> : vector<8x8xf32>
    %36 = tpu.matmul %35, %22, %cst_13 {dimension_numbers = #tpu.dot_dimension_numbers<[1], [0], [0], [1], [0, 0, 1, 1], [], []>} : vector<8x8xbf16>, vector<8x8xbf16>, vector<8x8xf32> -> vector<8x8xf32>
    %c0_14 = arith.constant 0 : index
    %c0_15 = arith.constant 0 : index
    %37 = vector.load %arg16[%c0_14, %c0_15] : memref<16x32xf32, #tpu.memory_space<vmem>>, vector<8x8xf32>
    tpu.vector_store %arg16[%c0_14, %c0_15], %36 {strides = array<i32>} : memref<16x32xf32, #tpu.memory_space<vmem>>, vector<8x8xf32>,
    %38 = vector.extract_strided_slice %11 {offsets = [0, 8], sizes = [8, 8], strides = [1, 1]} : vector<16x32xbf16> to vector<8x8xbf16>
    %39 = vector.extract_strided_slice %13 {offsets = [0, 8], sizes = [8, 8], strides = [1, 1]} : vector<16x32xbf16> to vector<8x8xbf16>
    %40 = vector.extract_strided_slice %15 {offsets = [0, 8], sizes = [8, 8], strides = [1, 1]} : vector<16x32xbf16> to vector<8x8xbf16>
    %cst_16 = arith.constant dense<0.000000e+00> : vector<8x8xf32>
    %41 = tpu.matmul %38, %39, %cst_16 {dimension_numbers = #tpu.dot_dimension_numbers<[1], [1], [0], [0], [0, 0, 1, 0], [], []>} : vector<8x8xbf16>, vector<8x8xbf16>, vector<8x8xf32> -> vector<8x8xf32>
    %42 = arith.addf %41, %19 : vector<8x8xf32>
    %cst_17 = arith.constant dense<0xFF800000> : vector<8xf32>
    %43 = vector.multi_reduction <maximumf>, %42, %cst_17 [1] : vector<8x8xf32> to vector<8xf32>
    %44 = vector.shape_cast %43 : vector<8xf32> to vector<8x1xf32>
    %45 = vector.broadcast %44 : vector<8x1xf32> to vector<8x8xf32>
    %46 = arith.subf %42, %45 : vector<8x8xf32>
    %47 = math.exp %46 : vector<8x8xf32>
    %cst_18 = arith.constant dense<0.000000e+00> : vector<8xf32>
    %48 = vector.multi_reduction <add>, %47, %cst_18 [1] : vector<8x8xf32> to vector<8xf32>
    %49 = vector.shape_cast %48 : vector<8xf32> to vector<8x1xf32>
    %50 = tpu.reciprocal %49 {approx = true} : vector<8x1xf32> -> vector<8x1xf32>
    %51 = vector.broadcast %50 : vector<8x1xf32> to vector<8x8xf32>
    %52 = arith.mulf %47, %51 : vector<8x8xf32>
    %53 = arith.truncf %52 : vector<8x8xf32> to vector<8x8xbf16>
    %cst_19 = arith.constant dense<0.000000e+00> : vector<8x8xf32>
    %54 = tpu.matmul %53, %40, %cst_19 {dimension_numbers = #tpu.dot_dimension_numbers<[1], [0], [0], [1], [0, 0, 1, 1], [], []>} : vector<8x8xbf16>, vector<8x8xbf16>, vector<8x8xf32> -> vector<8x8xf32>
    %c0_20 = arith.constant 0 : index
    %c8 = arith.constant 8 : index
    %55 = vector.load %arg16[%c0_20, %c8] : memref<16x32xf32, #tpu.memory_space<vmem>>, vector<8x8xf32>
    tpu.vector_store %arg16[%c0_20, %c8], %54 {strides = array<i32>} : memref<16x32xf32, #tpu.memory_space<vmem>>, vector<8x8xf32>,
    %56 = vector.extract_strided_slice %11 {offsets = [0, 16], sizes = [8, 8], strides = [1, 1]} : vector<16x32xbf16> to vector<8x8xbf16>
    %57 = vector.extract_strided_slice %13 {offsets = [0, 16], sizes = [8, 8], strides = [1, 1]} : vector<16x32xbf16> to vector<8x8xbf16>
    %58 = vector.extract_strided_slice %15 {offsets = [0, 16], sizes = [8, 8], strides = [1, 1]} : vector<16x32xbf16> to vector<8x8xbf16>
    %cst_21 = arith.constant dense<0.000000e+00> : vector<8x8xf32>
    %59 = tpu.matmul %56, %57, %cst_21 {dimension_numbers = #tpu.dot_dimension_numbers<[1], [1], [0], [0], [0, 0, 1, 0], [], []>} : vector<8x8xbf16>, vector<8x8xbf16>, vector<8x8xf32> -> vector<8x8xf32>
    %60 = arith.addf %59, %19 : vector<8x8xf32>
    %cst_22 = arith.constant dense<0xFF800000> : vector<8xf32>
    %61 = vector.multi_reduction <maximumf>, %60, %cst_22 [1] : vector<8x8xf32> to vector<8xf32>
    %62 = vector.shape_cast %61 : vector<8xf32> to vector<8x1xf32>
    %63 = vector.broadcast %62 : vector<8x1xf32> to vector<8x8xf32>
    %64 = arith.subf %60, %63 : vector<8x8xf32>
    %65 = math.exp %64 : vector<8x8xf32>
    %cst_23 = arith.constant dense<0.000000e+00> : vector<8xf32>
    %66 = vector.multi_reduction <add>, %65, %cst_23 [1] : vector<8x8xf32> to vector<8xf32>
    %67 = vector.shape_cast %66 : vector<8xf32> to vector<8x1xf32>
    %68 = tpu.reciprocal %67 {approx = true} : vector<8x1xf32> -> vector<8x1xf32>
    %69 = vector.broadcast %68 : vector<8x1xf32> to vector<8x8xf32>
    %70 = arith.mulf %65, %69 : vector<8x8xf32>
    %71 = arith.truncf %70 : vector<8x8xf32> to vector<8x8xbf16>
    %cst_24 = arith.constant dense<0.000000e+00> : vector<8x8xf32>
    %72 = tpu.matmul %71, %58, %cst_24 {dimension_numbers = #tpu.dot_dimension_numbers<[1], [0], [0], [1], [0, 0, 1, 1], [], []>} : vector<8x8xbf16>, vector<8x8xbf16>, vector<8x8xf32> -> vector<8x8xf32>
    %c0_25 = arith.constant 0 : index
    %c16 = arith.constant 16 : index
    %73 = vector.load %arg16[%c0_25, %c16] : memref<16x32xf32, #tpu.memory_space<vmem>>, vector<8x8xf32>
    tpu.vector_store %arg16[%c0_25, %c16], %72 {strides = array<i32>} : memref<16x32xf32, #tpu.memory_space<vmem>>, vector<8x8xf32>,
    %74 = vector.extract_strided_slice %11 {offsets = [0, 24], sizes = [8, 8], strides = [1, 1]} : vector<16x32xbf16> to vector<8x8xbf16>
    %75 = vector.extract_strided_slice %13 {offsets = [0, 24], sizes = [8, 8], strides = [1, 1]} : vector<16x32xbf16> to vector<8x8xbf16>
    %76 = vector.extract_strided_slice %15 {offsets = [0, 24], sizes = [8, 8], strides = [1, 1]} : vector<16x32xbf16> to vector<8x8xbf16>
    %cst_26 = arith.constant dense<0.000000e+00> : vector<8x8xf32>
    %77 = tpu.matmul %74, %75, %cst_26 {dimension_numbers = #tpu.dot_dimension_numbers<[1], [1], [0], [0], [0, 0, 1, 0], [], []>} : vector<8x8xbf16>, vector<8x8xbf16>, vector<8x8xf32> -> vector<8x8xf32>
    %78 = arith.addf %77, %19 : vector<8x8xf32>
    %cst_27 = arith.constant dense<0xFF800000> : vector<8xf32>
    %79 = vector.multi_reduction <maximumf>, %78, %cst_27 [1] : vector<8x8xf32> to vector<8xf32>
    %80 = vector.shape_cast %79 : vector<8xf32> to vector<8x1xf32>
    %81 = vector.broadcast %80 : vector<8x1xf32> to vector<8x8xf32>
    %82 = arith.subf %78, %81 : vector<8x8xf32>
    %83 = math.exp %82 : vector<8x8xf32>
    %cst_28 = arith.constant dense<0.000000e+00> : vector<8xf32>
    %84 = vector.multi_reduction <add>, %83, %cst_28 [1] : vector<8x8xf32> to vector<8xf32>
    %85 = vector.shape_cast %84 : vector<8xf32> to vector<8x1xf32>
    %86 = tpu.reciprocal %85 {approx = true} : vector<8x1xf32> -> vector<8x1xf32>
    %87 = vector.broadcast %86 : vector<8x1xf32> to vector<8x8xf32>
    %88 = arith.mulf %83, %87 : vector<8x8xf32>
    %89 = arith.truncf %88 : vector<8x8xf32> to vector<8x8xbf16>
    %cst_29 = arith.constant dense<0.000000e+00> : vector<8x8xf32>
    %90 = tpu.matmul %89, %76, %cst_29 {dimension_numbers = #tpu.dot_dimension_numbers<[1], [0], [0], [1], [0, 0, 1, 1], [], []>} : vector<8x8xbf16>, vector<8x8xbf16>, vector<8x8xf32> -> vector<8x8xf32>
    %c0_30 = arith.constant 0 : index
    %c24 = arith.constant 24 : index
    %91 = vector.load %arg16[%c0_30, %c24] : memref<16x32xf32, #tpu.memory_space<vmem>>, vector<8x8xf32>
    tpu.vector_store %arg16[%c0_30, %c24], %90 {strides = array<i32>} : memref<16x32xf32, #tpu.memory_space<vmem>>, vector<8x8xf32>,
    %c1 = arith.constant 1 : index
    %c0_31 = arith.constant 0 : index
    %c0_32 = arith.constant 0 : index
    %92 = vector.load %arg1[%c1, %c0_31, %c0_32] : memref<2x1x8xf32, #tpu.memory_space<vmem>>, vector<1x1x8xf32>
    %93 = vector.shape_cast %92 : vector<1x1x8xf32> to vector<1x8xf32>
    %94 = vector.shape_cast %93 : vector<1x8xf32> to vector<1x8xf32>
    %95 = vector.broadcast %94 : vector<1x8xf32> to vector<8x8xf32>
    %96 = vector.extract_strided_slice %11 {offsets = [8, 0], sizes = [8, 8], strides = [1, 1]} : vector<16x32xbf16> to vector<8x8xbf16>
    %97 = vector.extract_strided_slice %13 {offsets = [8, 0], sizes = [8, 8], strides = [1, 1]} : vector<16x32xbf16> to vector<8x8xbf16>
    %98 = vector.extract_strided_slice %15 {offsets = [8, 0], sizes = [8, 8], strides = [1, 1]} : vector<16x32xbf16> to vector<8x8xbf16>
    %cst_33 = arith.constant dense<0.000000e+00> : vector<8x8xf32>
    %99 = tpu.matmul %96, %97, %cst_33 {dimension_numbers = #tpu.dot_dimension_numbers<[1], [1], [0], [0], [0, 0, 1, 0], [], []>} : vector<8x8xbf16>, vector<8x8xbf16>, vector<8x8xf32> -> vector<8x8xf32>
    %100 = arith.addf %99, %95 : vector<8x8xf32>
    %cst_34 = arith.constant dense<0xFF800000> : vector<8xf32>
    %101 = vector.multi_reduction <maximumf>, %100, %cst_34 [1] : vector<8x8xf32> to vector<8xf32>
    %102 = vector.shape_cast %101 : vector<8xf32> to vector<8x1xf32>
    %103 = vector.broadcast %102 : vector<8x1xf32> to vector<8x8xf32>
    %104 = arith.subf %100, %103 : vector<8x8xf32>
    %105 = math.exp %104 : vector<8x8xf32>
    %cst_35 = arith.constant dense<0.000000e+00> : vector<8xf32>
    %106 = vector.multi_reduction <add>, %105, %cst_35 [1] : vector<8x8xf32> to vector<8xf32>
    %107 = vector.shape_cast %106 : vector<8xf32> to vector<8x1xf32>
    %108 = tpu.reciprocal %107 {approx = true} : vector<8x1xf32> -> vector<8x1xf32>
    %109 = vector.broadcast %108 : vector<8x1xf32> to vector<8x8xf32>
    %110 = arith.mulf %105, %109 : vector<8x8xf32>
    %111 = arith.truncf %110 : vector<8x8xf32> to vector<8x8xbf16>
    %cst_36 = arith.constant dense<0.000000e+00> : vector<8x8xf32>
    %112 = tpu.matmul %111, %98, %cst_36 {dimension_numbers = #tpu.dot_dimension_numbers<[1], [0], [0], [1], [0, 0, 1, 1], [], []>} : vector<8x8xbf16>, vector<8x8xbf16>, vector<8x8xf32> -> vector<8x8xf32>
    %c8_37 = arith.constant 8 : index
    %c0_38 = arith.constant 0 : index
    %113 = vector.load %arg16[%c8_37, %c0_38] : memref<16x32xf32, #tpu.memory_space<vmem>>, vector<8x8xf32>
    tpu.vector_store %arg16[%c8_37, %c0_38], %112 {strides = array<i32>} : memref<16x32xf32, #tpu.memory_space<vmem>>, vector<8x8xf32>,
    %114 = vector.extract_strided_slice %11 {offsets = [8, 8], sizes = [8, 8], strides = [1, 1]} : vector<16x32xbf16> to vector<8x8xbf16>
    %115 = vector.extract_strided_slice %13 {offsets = [8, 8], sizes = [8, 8], strides = [1, 1]} : vector<16x32xbf16> to vector<8x8xbf16>
    %116 = vector.extract_strided_slice %15 {offsets = [8, 8], sizes = [8, 8], strides = [1, 1]} : vector<16x32xbf16> to vector<8x8xbf16>
    %cst_39 = arith.constant dense<0.000000e+00> : vector<8x8xf32>
    %117 = tpu.matmul %114, %115, %cst_39 {dimension_numbers = #tpu.dot_dimension_numbers<[1], [1], [0], [0], [0, 0, 1, 0], [], []>} : vector<8x8xbf16>, vector<8x8xbf16>, vector<8x8xf32> -> vector<8x8xf32>
    %118 = arith.addf %117, %95 : vector<8x8xf32>
    %cst_40 = arith.constant dense<0xFF800000> : vector<8xf32>
    %119 = vector.multi_reduction <maximumf>, %118, %cst_40 [1] : vector<8x8xf32> to vector<8xf32>
    %120 = vector.shape_cast %119 : vector<8xf32> to vector<8x1xf32>
    %121 = vector.broadcast %120 : vector<8x1xf32> to vector<8x8xf32>
    %122 = arith.subf %118, %121 : vector<8x8xf32>
    %123 = math.exp %122 : vector<8x8xf32>
    %cst_41 = arith.constant dense<0.000000e+00> : vector<8xf32>
    %124 = vector.multi_reduction <add>, %123, %cst_41 [1] : vector<8x8xf32> to vector<8xf32>
    %125 = vector.shape_cast %124 : vector<8xf32> to vector<8x1xf32>
    %126 = tpu.reciprocal %125 {approx = true} : vector<8x1xf32> -> vector<8x1xf32>
    %127 = vector.broadcast %126 : vector<8x1xf32> to vector<8x8xf32>
    %128 = arith.mulf %123, %127 : vector<8x8xf32>
    %129 = arith.truncf %128 : vector<8x8xf32> to vector<8x8xbf16>
    %cst_42 = arith.constant dense<0.000000e+00> : vector<8x8xf32>
    %130 = tpu.matmul %129, %116, %cst_42 {dimension_numbers = #tpu.dot_dimension_numbers<[1], [0], [0], [1], [0, 0, 1, 1], [], []>} : vector<8x8xbf16>, vector<8x8xbf16>, vector<8x8xf32> -> vector<8x8xf32>
    %c8_43 = arith.constant 8 : index
    %c8_44 = arith.constant 8 : index
    %131 = vector.load %arg16[%c8_43, %c8_44] : memref<16x32xf32, #tpu.memory_space<vmem>>, vector<8x8xf32>
    tpu.vector_store %arg16[%c8_43, %c8_44], %130 {strides = array<i32>} : memref<16x32xf32, #tpu.memory_space<vmem>>, vector<8x8xf32>,
    %132 = vector.extract_strided_slice %11 {offsets = [8, 16], sizes = [8, 8], strides = [1, 1]} : vector<16x32xbf16> to vector<8x8xbf16>
    %133 = vector.extract_strided_slice %13 {offsets = [8, 16], sizes = [8, 8], strides = [1, 1]} : vector<16x32xbf16> to vector<8x8xbf16>
    %134 = vector.extract_strided_slice %15 {offsets = [8, 16], sizes = [8, 8], strides = [1, 1]} : vector<16x32xbf16> to vector<8x8xbf16>
    %cst_45 = arith.constant dense<0.000000e+00> : vector<8x8xf32>
    %135 = tpu.matmul %132, %133, %cst_45 {dimension_numbers = #tpu.dot_dimension_numbers<[1], [1], [0], [0], [0, 0, 1, 0], [], []>} : vector<8x8xbf16>, vector<8x8xbf16>, vector<8x8xf32> -> vector<8x8xf32>
    %136 = arith.addf %135, %95 : vector<8x8xf32>
    %cst_46 = arith.constant dense<0xFF800000> : vector<8xf32>
    %137 = vector.multi_reduction <maximumf>, %136, %cst_46 [1] : vector<8x8xf32> to vector<8xf32>
    %138 = vector.shape_cast %137 : vector<8xf32> to vector<8x1xf32>
    %139 = vector.broadcast %138 : vector<8x1xf32> to vector<8x8xf32>
    %140 = arith.subf %136, %139 : vector<8x8xf32>
    %141 = math.exp %140 : vector<8x8xf32>
    %cst_47 = arith.constant dense<0.000000e+00> : vector<8xf32>
    %142 = vector.multi_reduction <add>, %141, %cst_47 [1] : vector<8x8xf32> to vector<8xf32>
    %143 = vector.shape_cast %142 : vector<8xf32> to vector<8x1xf32>
    %144 = tpu.reciprocal %143 {approx = true} : vector<8x1xf32> -> vector<8x1xf32>
    %145 = vector.broadcast %144 : vector<8x1xf32> to vector<8x8xf32>
    %146 = arith.mulf %141, %145 : vector<8x8xf32>
    %147 = arith.truncf %146 : vector<8x8xf32> to vector<8x8xbf16>
    %cst_48 = arith.constant dense<0.000000e+00> : vector<8x8xf32>
    %148 = tpu.matmul %147, %134, %cst_48 {dimension_numbers = #tpu.dot_dimension_numbers<[1], [0], [0], [1], [0, 0, 1, 1], [], []>} : vector<8x8xbf16>, vector<8x8xbf16>, vector<8x8xf32> -> vector<8x8xf32>
    %c8_49 = arith.constant 8 : index
    %c16_50 = arith.constant 16 : index
    %149 = vector.load %arg16[%c8_49, %c16_50] : memref<16x32xf32, #tpu.memory_space<vmem>>, vector<8x8xf32>
    tpu.vector_store %arg16[%c8_49, %c16_50], %148 {strides = array<i32>} : memref<16x32xf32, #tpu.memory_space<vmem>>, vector<8x8xf32>,
    %150 = vector.extract_strided_slice %11 {offsets = [8, 24], sizes = [8, 8], strides = [1, 1]} : vector<16x32xbf16> to vector<8x8xbf16>
    %151 = vector.extract_strided_slice %13 {offsets = [8, 24], sizes = [8, 8], strides = [1, 1]} : vector<16x32xbf16> to vector<8x8xbf16>
    %152 = vector.extract_strided_slice %15 {offsets = [8, 24], sizes = [8, 8], strides = [1, 1]} : vector<16x32xbf16> to vector<8x8xbf16>
    %cst_51 = arith.constant dense<0.000000e+00> : vector<8x8xf32>
    %153 = tpu.matmul %150, %151, %cst_51 {dimension_numbers = #tpu.dot_dimension_numbers<[1], [1], [0], [0], [0, 0, 1, 0], [], []>} : vector<8x8xbf16>, vector<8x8xbf16>, vector<8x8xf32> -> vector<8x8xf32>
    %154 = arith.addf %153, %95 : vector<8x8xf32>
    %cst_52 = arith.constant dense<0xFF800000> : vector<8xf32>
    %155 = vector.multi_reduction <maximumf>, %154, %cst_52 [1] : vector<8x8xf32> to vector<8xf32>
    %156 = vector.shape_cast %155 : vector<8xf32> to vector<8x1xf32>
    %157 = vector.broadcast %156 : vector<8x1xf32> to vector<8x8xf32>
    %158 = arith.subf %154, %157 : vector<8x8xf32>
    %159 = math.exp %158 : vector<8x8xf32>
    %cst_53 = arith.constant dense<0.000000e+00> : vector<8xf32>
    %160 = vector.multi_reduction <add>, %159, %cst_53 [1] : vector<8x8xf32> to vector<8xf32>
    %161 = vector.shape_cast %160 : vector<8xf32> to vector<8x1xf32>
    %162 = tpu.reciprocal %161 {approx = true} : vector<8x1xf32> -> vector<8x1xf32>
    %163 = vector.broadcast %162 : vector<8x1xf32> to vector<8x8xf32>
    %164 = arith.mulf %159, %163 : vector<8x8xf32>
    %165 = arith.truncf %164 : vector<8x8xf32> to vector<8x8xbf16>
    %cst_54 = arith.constant dense<0.000000e+00> : vector<8x8xf32>
    %166 = tpu.matmul %165, %152, %cst_54 {dimension_numbers = #tpu.dot_dimension_numbers<[1], [0], [0], [1], [0, 0, 1, 1], [], []>} : vector<8x8xbf16>, vector<8x8xbf16>, vector<8x8xf32> -> vector<8x8xf32>
    %c8_55 = arith.constant 8 : index
    %c24_56 = arith.constant 24 : index
    %167 = vector.load %arg16[%c8_55, %c24_56] : memref<16x32xf32, #tpu.memory_space<vmem>>, vector<8x8xf32>
    tpu.vector_store %arg16[%c8_55, %c24_56], %166 {strides = array<i32>} : memref<16x32xf32, #tpu.memory_space<vmem>>, vector<8x8xf32>,
    %c0_57 = arith.constant 0 : index
    %c0_58 = arith.constant 0 : index
    %168 = vector.load %arg16[%c0_57, %c0_58] : memref<16x32xf32, #tpu.memory_space<vmem>>, vector<16x32xf32>
    %169 = arith.truncf %168 : vector<16x32xf32> to vector<16x32xbf16>
    %c0_59 = arith.constant 0 : index
    %c0_60 = arith.constant 0 : index
    %170 = vector.load %arg5[%c0_59, %c0_60] : memref<32x32xbf16, #tpu.memory_space<vmem>>, vector<32x32xbf16>
    %cst_61 = arith.constant dense<0.000000e+00> : vector<16x32xf32>
    %171 = tpu.matmul %169, %170, %cst_61 {dimension_numbers = #tpu.dot_dimension_numbers<[1], [0], [0], [1], [0, 0, 1, 1], [], []>} : vector<16x32xbf16>, vector<32x32xbf16>, vector<16x32xf32> -> vector<16x32xf32>
    %c0_62 = arith.constant 0 : index
    %c0_63 = arith.constant 0 : index
    %172 = vector.load %arg6[%c0_62, %c0_63] : memref<1x32xf32, #tpu.memory_space<vmem>>, vector<1x32xf32>
    %173 = vector.broadcast %172 : vector<1x32xf32> to vector<16x32xf32>
    %174 = arith.addf %171, %173 : vector<16x32xf32>
    %175 = arith.addf %1, %174 : vector<16x32xf32>
    %c0_64 = arith.constant 0 : index
    %c0_65 = arith.constant 0 : index
    %176 = vector.load %arg7[%c0_64, %c0_65] : memref<1x32xf32, #tpu.memory_space<vmem>>, vector<1x32xf32>
    %c0_66 = arith.constant 0 : index
    %c0_67 = arith.constant 0 : index
    %177 = vector.load %arg8[%c0_66, %c0_67] : memref<1x32xf32, #tpu.memory_space<vmem>>, vector<1x32xf32>
    %cst_68 = arith.constant dense<0.000000e+00> : vector<16xf32>
    %178 = vector.multi_reduction <add>, %175, %cst_68 [1] : vector<16x32xf32> to vector<16xf32>
    %179 = vector.shape_cast %178 : vector<16xf32> to vector<16x1xf32>
    %cst_69 = arith.constant 3.200000e+01 : f32
    %180 = vector.broadcast %cst_69 : f32 to vector<16x1xf32>
    %181 = arith.divf %179, %180 : vector<16x1xf32>
    %182 = vector.broadcast %181 : vector<16x1xf32> to vector<16x32xf32>
    %183 = arith.subf %175, %182 : vector<16x32xf32>
    %184 = arith.mulf %183, %183 : vector<16x32xf32>
    %cst_70 = arith.constant dense<0.000000e+00> : vector<16xf32>
    %185 = vector.multi_reduction <add>, %184, %cst_70 [1] : vector<16x32xf32> to vector<16xf32>
    %186 = vector.shape_cast %185 : vector<16xf32> to vector<16x1xf32>
    %cst_71 = arith.constant 3.200000e+01 : f32
    %187 = vector.broadcast %cst_71 : f32 to vector<16x1xf32>
    %188 = arith.divf %186, %187 : vector<16x1xf32>
    %189 = vector.broadcast %181 : vector<16x1xf32> to vector<16x32xf32>
    %190 = arith.subf %175, %189 : vector<16x32xf32>
    %cst_72 = arith.constant 9.99999974E-6 : f32
    %191 = vector.broadcast %cst_72 : f32 to vector<16x1xf32>
    %192 = arith.addf %188, %191 : vector<16x1xf32>
    %193 = math.rsqrt %192 : vector<16x1xf32>
    %194 = vector.broadcast %193 : vector<16x1xf32> to vector<16x32xf32>
    %195 = arith.mulf %190, %194 : vector<16x32xf32>
    %196 = vector.broadcast %176 : vector<1x32xf32> to vector<16x32xf32>
    %197 = arith.mulf %195, %196 : vector<16x32xf32>
    %198 = vector.broadcast %177 : vector<1x32xf32> to vector<16x32xf32>
    %199 = arith.addf %197, %198 : vector<16x32xf32>
    %200 = arith.truncf %199 : vector<16x32xf32> to vector<16x32xbf16>
    %c0_73 = arith.constant 0 : index
    %c0_74 = arith.constant 0 : index
    %201 = vector.load %arg9[%c0_73, %c0_74] : memref<32x64xbf16, #tpu.memory_space<vmem>>, vector<32x64xbf16>
    %cst_75 = arith.constant dense<0.000000e+00> : vector<16x64xf32>
    %202 = tpu.matmul %200, %201, %cst_75 {dimension_numbers = #tpu.dot_dimension_numbers<[1], [0], [0], [1], [0, 0, 1, 1], [], []>} : vector<16x32xbf16>, vector<32x64xbf16>, vector<16x64xf32> -> vector<16x64xf32>
    %c0_76 = arith.constant 0 : index
    %c0_77 = arith.constant 0 : index
    %203 = vector.load %arg10[%c0_76, %c0_77] : memref<1x64xf32, #tpu.memory_space<vmem>>, vector<1x64xf32>
    %204 = vector.broadcast %203 : vector<1x64xf32> to vector<16x64xf32>
    %205 = arith.addf %202, %204 : vector<16x64xf32>
    %cst_78 = arith.constant 5.000000e-01 : f32
    %206 = vector.broadcast %cst_78 : f32 to vector<16x64xf32>
    %207 = arith.mulf %206, %205 : vector<16x64xf32>
    %cst_79 = arith.constant 0.707106769 : f32
    %208 = vector.broadcast %cst_79 : f32 to vector<16x64xf32>
    %209 = arith.mulf %205, %208 : vector<16x64xf32>
    %cst_80 = arith.constant 0.000000e+00 : f32
    %210 = vector.broadcast %cst_80 : f32 to vector<16x64xf32>
    %211 = arith.cmpf oge, %209, %210 : vector<16x64xf32>
    %cst_81 = arith.constant 1.000000e+00 : f32
    %cst_82 = arith.constant -1.000000e+00 : f32
    %212 = vector.broadcast %cst_81 : f32 to vector<16x64xf32>
    %213 = vector.broadcast %cst_82 : f32 to vector<16x64xf32>
    %214 = arith.select %211, %212, %213 : vector<16x64xi1>, vector<16x64xf32>
    %215 = math.absf %209 : vector<16x64xf32>
    %cst_83 = arith.constant 0.327591091 : f32
    %216 = vector.broadcast %cst_83 : f32 to vector<16x64xf32>
    %217 = arith.mulf %216, %215 : vector<16x64xf32>
    %cst_84 = arith.constant 1.000000e+00 : f32
    %218 = vector.broadcast %cst_84 : f32 to vector<16x64xf32>
    %219 = arith.addf %218, %217 : vector<16x64xf32>
    %cst_85 = arith.constant 1.000000e+00 : f32
    %220 = vector.broadcast %cst_85 : f32 to vector<16x64xf32>
    %221 = arith.divf %220, %219 : vector<16x64xf32>
    %cst_86 = arith.constant 1.06140542 : f32
    %222 = vector.broadcast %cst_86 : f32 to vector<16x64xf32>
    %223 = arith.mulf %222, %221 : vector<16x64xf32>
    %cst_87 = arith.constant -1.45315206 : f32
    %224 = vector.broadcast %cst_87 : f32 to vector<16x64xf32>
    %225 = arith.addf %223, %224 : vector<16x64xf32>
    %226 = arith.mulf %225, %221 : vector<16x64xf32>
    %cst_88 = arith.constant 1.42141378 : f32
    %227 = vector.broadcast %cst_88 : f32 to vector<16x64xf32>
    %228 = arith.addf %226, %227 : vector<16x64xf32>
    %229 = arith.mulf %228, %221 : vector<16x64xf32>
    %cst_89 = arith.constant -0.284496725 : f32
    %230 = vector.broadcast %cst_89 : f32 to vector<16x64xf32>
    %231 = arith.addf %229, %230 : vector<16x64xf32>
    %232 = arith.mulf %231, %221 : vector<16x64xf32>
    %cst_90 = arith.constant 0.254829586 : f32
    %233 = vector.broadcast %cst_90 : f32 to vector<16x64xf32>
    %234 = arith.addf %232, %233 : vector<16x64xf32>
    %235 = arith.mulf %234, %221 : vector<16x64xf32>
    %cst_91 = arith.constant 0.000000e+00 : f32
    %236 = vector.broadcast %cst_91 : f32 to vector<16x64xf32>
    %237 = arith.subf %236, %215 : vector<16x64xf32>
    %238 = arith.mulf %237, %215 : vector<16x64xf32>
    %239 = math.exp %238 : vector<16x64xf32>
    %240 = arith.mulf %235, %239 : vector<16x64xf32>
    %cst_92 = arith.constant 1.000000e+00 : f32
    %241 = vector.broadcast %cst_92 : f32 to vector<16x64xf32>
    %242 = arith.subf %241, %240 : vector<16x64xf32>
    %243 = arith.mulf %214, %242 : vector<16x64xf32>
    %cst_93 = arith.constant 1.000000e+00 : f32
    %244 = vector.broadcast %cst_93 : f32 to vector<16x64xf32>
    %245 = arith.addf %244, %243 : vector<16x64xf32>
    %246 = arith.mulf %207, %245 : vector<16x64xf32>
    %247 = arith.truncf %246 : vector<16x64xf32> to vector<16x64xbf16>
    %c0_94 = arith.constant 0 : index
    %c0_95 = arith.constant 0 : index
    %248 = vector.load %arg11[%c0_94, %c0_95] : memref<64x32xbf16, #tpu.memory_space<vmem>>, vector<64x32xbf16>
    %cst_96 = arith.constant dense<0.000000e+00> : vector<16x32xf32>
    %249 = tpu.matmul %247, %248, %cst_96 {dimension_numbers = #tpu.dot_dimension_numbers<[1], [0], [0], [1], [0, 0, 1, 1], [], []>} : vector<16x64xbf16>, vector<64x32xbf16>, vector<16x32xf32> -> vector<16x32xf32>
    %c0_97 = arith.constant 0 : index
    %c0_98 = arith.constant 0 : index
    %250 = vector.load %arg12[%c0_97, %c0_98] : memref<1x32xf32, #tpu.memory_space<vmem>>, vector<1x32xf32>
    %251 = vector.broadcast %250 : vector<1x32xf32> to vector<16x32xf32>
    %252 = arith.addf %249, %251 : vector<16x32xf32>
    %253 = arith.addf %199, %252 : vector<16x32xf32>
    %c0_99 = arith.constant 0 : index
    %c0_100 = arith.constant 0 : index
    %254 = vector.load %arg13[%c0_99, %c0_100] : memref<1x32xf32, #tpu.memory_space<vmem>>, vector<1x32xf32>
    %c0_101 = arith.constant 0 : index
    %c0_102 = arith.constant 0 : index
    %255 = vector.load %arg14[%c0_101, %c0_102] : memref<1x32xf32, #tpu.memory_space<vmem>>, vector<1x32xf32>
    %cst_103 = arith.constant dense<0.000000e+00> : vector<16xf32>
    %256 = vector.multi_reduction <add>, %253, %cst_103 [1] : vector<16x32xf32> to vector<16xf32>
    %257 = vector.shape_cast %256 : vector<16xf32> to vector<16x1xf32>
    %cst_104 = arith.constant 3.200000e+01 : f32
    %258 = vector.broadcast %cst_104 : f32 to vector<16x1xf32>
    %259 = arith.divf %257, %258 : vector<16x1xf32>
    %260 = vector.broadcast %259 : vector<16x1xf32> to vector<16x32xf32>
    %261 = arith.subf %253, %260 : vector<16x32xf32>
    %262 = arith.mulf %261, %261 : vector<16x32xf32>
    %cst_105 = arith.constant dense<0.000000e+00> : vector<16xf32>
    %263 = vector.multi_reduction <add>, %262, %cst_105 [1] : vector<16x32xf32> to vector<16xf32>
    %264 = vector.shape_cast %263 : vector<16xf32> to vector<16x1xf32>
    %cst_106 = arith.constant 3.200000e+01 : f32
    %265 = vector.broadcast %cst_106 : f32 to vector<16x1xf32>
    %266 = arith.divf %264, %265 : vector<16x1xf32>
    %267 = vector.broadcast %259 : vector<16x1xf32> to vector<16x32xf32>
    %268 = arith.subf %253, %267 : vector<16x32xf32>
    %cst_107 = arith.constant 9.99999974E-6 : f32
    %269 = vector.broadcast %cst_107 : f32 to vector<16x1xf32>
    %270 = arith.addf %266, %269 : vector<16x1xf32>
    %271 = math.rsqrt %270 : vector<16x1xf32>
    %272 = vector.broadcast %271 : vector<16x1xf32> to vector<16x32xf32>
    %273 = arith.mulf %268, %272 : vector<16x32xf32>
    %274 = vector.broadcast %254 : vector<1x32xf32> to vector<16x32xf32>
    %275 = arith.mulf %273, %274 : vector<16x32xf32>
    %276 = vector.broadcast %255 : vector<1x32xf32> to vector<16x32xf32>
    %277 = arith.addf %275, %276 : vector<16x32xf32>
    %278 = vector.shape_cast %277 : vector<16x32xf32> to vector<2x8x32xf32>
    %c0_108 = arith.constant 0 : index
    %c0_109 = arith.constant 0 : index
    %c0_110 = arith.constant 0 : index
    %279 = vector.load %arg15[%c0_108, %c0_109, %c0_110] : memref<2x8x32xf32, #tpu.memory_space<vmem>>, vector<2x8x32xf32>
    tpu.vector_store %arg15[%c0_108, %c0_109, %c0_110], %278 {strides = array<i32>} : memref<2x8x32xf32, #tpu.memory_space<vmem>>, vector<2x8x32xf32>,
    return
  }
  func.func @transform_0(%arg0: i32) -> (i32, i32, i32) {
    %c0_i32 = arith.constant 0 : i32
    %c0_i32_0 = arith.constant 0 : i32
    %c0_i32_1 = arith.constant 0 : i32
    return %arg0, %c0_i32, %c0_i32_0 : i32, i32, i32
  }
  func.func @transform_1(%arg0: i32) -> (i32, i32, i32) {
    %c0_i32 = arith.constant 0 : i32
    %c0_i32_0 = arith.constant 0 : i32
    %c0_i32_1 = arith.constant 0 : i32
    return %arg0, %c0_i32, %c0_i32_0 : i32, i32, i32
  }
  func.func @transform_2(%arg0: i32) -> (i32, i32) {
    %c0_i32 = arith.constant 0 : i32
    %c0_i32_0 = arith.constant 0 : i32
    %c0_i32_1 = arith.constant 0 : i32
    return %c0_i32, %c0_i32_0 : i32, i32
  }
  func.func @transform_3(%arg0: i32) -> (i32, i32) {
    %c0_i32 = arith.constant 0 : i32
    %c0_i32_0 = arith.constant 0 : i32
    %c0_i32_1 = arith.constant 0 : i32
    return %c0_i32, %c0_i32_0 : i32, i32
  }
  func.func @transform_4(%arg0: i32) -> (i32, i32) {
    %c0_i32 = arith.constant 0 : i32
    %c0_i32_0 = arith.constant 0 : i32
    %c0_i32_1 = arith.constant 0 : i32
    return %c0_i32, %c0_i32_0 : i32, i32
  }
  func.func @transform_5(%arg0: i32) -> (i32, i32) {
    %c0_i32 = arith.constant 0 : i32
    %c0_i32_0 = arith.constant 0 : i32
    %c0_i32_1 = arith.constant 0 : i32
    return %c0_i32, %c0_i32_0 : i32, i32
  }
  func.func @transform_6(%arg0: i32) -> (i32, i32) {
    %c0_i32 = arith.constant 0 : i32
    %c0_i32_0 = arith.constant 0 : i32
    %c0_i32_1 = arith.constant 0 : i32
    return %c0_i32, %c0_i32_0 : i32, i32
  }
  func.func @transform_7(%arg0: i32) -> (i32, i32) {
    %c0_i32 = arith.constant 0 : i32
    %c0_i32_0 = arith.constant 0 : i32
    %c0_i32_1 = arith.constant 0 : i32
    return %c0_i32, %c0_i32_0 : i32, i32
  }
  func.func @transform_8(%arg0: i32) -> (i32, i32) {
    %c0_i32 = arith.constant 0 : i32
    %c0_i32_0 = arith.constant 0 : i32
    %c0_i32_1 = arith.constant 0 : i32
    return %c0_i32, %c0_i32_0 : i32, i32
  }
  func.func @transform_9(%arg0: i32) -> (i32, i32) {
    %c0_i32 = arith.constant 0 : i32
    %c0_i32_0 = arith.constant 0 : i32
    %c0_i32_1 = arith.constant 0 : i32
    return %c0_i32, %c0_i32_0 : i32, i32
  }
  func.func @transform_10(%arg0: i32) -> (i32, i32) {
    %c0_i32 = arith.constant 0 : i32
    %c0_i32_0 = arith.constant 0 : i32
    %c0_i32_1 = arith.constant 0 : i32
    return %c0_i32, %c0_i32_0 : i32, i32
  }
  func.func @transform_11(%arg0: i32) -> (i32, i32) {
    %c0_i32 = arith.constant 0 : i32
    %c0_i32_0 = arith.constant 0 : i32
    %c0_i32_1 = arith.constant 0 : i32
    return %c0_i32, %c0_i32_0 : i32, i32
  }
  func.func @transform_12(%arg0: i32) -> (i32, i32) {
    %c0_i32 = arith.constant 0 : i32
    %c0_i32_0 = arith.constant 0 : i32
    %c0_i32_1 = arith.constant 0 : i32
    return %c0_i32, %c0_i32_0 : i32, i32
  }
  func.func @transform_13(%arg0: i32) -> (i32, i32) {
    %c0_i32 = arith.constant 0 : i32
    %c0_i32_0 = arith.constant 0 : i32
    %c0_i32_1 = arith.constant 0 : i32
    return %c0_i32, %c0_i32_0 : i32, i32
  }
  func.func @transform_14(%arg0: i32) -> (i32, i32, i32) {
    %c0_i32 = arith.constant 0 : i32
    %c0_i32_0 = arith.constant 0 : i32
    %c0_i32_1 = arith.constant 0 : i32
    return %arg0, %c0_i32, %c0_i32_0 : i32, i32, i32
  }
}

</mosaic_0001>

<bundles_post_ra>
// kernel: tpu_custom_call.1
= control target key start
LH: loop header
LB: loop body
LE: loop exit
PB: predicated region body
PF: predicated region fallthrough
CT: control target
= control target key end

     0   :  { %19 = vsyncpa [#allocation4], 0  ;;  %s1548_s0 = inlined_call_operand.hbm [shape: f32[2,1,8], index: 0, kind: input, shape index: {}]   ;;  %s1549_s1 = inlined_call_operand.vmem [shape: f32[2,8,32], index: 1, kind: input, shape index: {}]   ;;  %s1550_s2 = inlined_call_operand.vmem [shape: bf16[32,96], index: 2, kind: input, shape index: {}]   ;;  %s1551_s3 = inlined_call_operand.vmem [shape: f32[1,96], index: 3, kind: input, shape index: {}]   ;;  %s1552_s4 = inlined_call_operand.vmem [shape: bf16[32,32], index: 4, kind: input, shape index: {}]   ;;  %s1553_s5 = inlined_call_operand.vmem [shape: f32[1,32], index: 5, kind: input, shape index: {}]   ;;  %s1554_s6 = inlined_call_operand.vmem [shape: f32[1,32], index: 6, kind: input, shape index: {}]   ;;  %s1555_s7 = inlined_call_operand.vmem [shape: f32[1,32], index: 7, kind: input, shape index: {}]   ;;  %s1556_s8 = inlined_call_operand.hbm [shape: bf16[32,64], index: 8, kind: input, shape index: {}]   ;;  %s1557_s9 = inlined_call_operand.vmem [shape: f32[1,64], index: 9, kind: input, shape index: {}]   ;;  %s1558_s10 = inlined_call_operand.vmem [shape: bf16[64,32], index: 10, kind: input, shape index: {}]   ;;  %s1559_s11 = inlined_call_operand.vmem [shape: f32[1,32], index: 11, kind: input, shape index: {}]   ;;  %s1560_s12 = inlined_call_operand.vmem [shape: f32[1,32], index: 12, kind: input, shape index: {}]   ;;  %s1561_s13 = inlined_call_operand.vmem [shape: f32[1,32], index: 13, kind: input, shape index: {}]   ;;  %s1562_s14 = inlined_call_operand.hbm [shape: f32[2,8,32], index: 14, kind: output, shape index: {}]  }
   0x1   :  { %20 = vsyncpa [#allocation7], 0 }
   0x2   :  { %21 = vsyncpa [#allocation5], 0  ;;  %s26_s15 = sshll.u32 %s1548_s0, 4  ;;  %s1218_s16 = smov [#allocation3]   ;;  %s27_s15 = int_to_ptr.hbm [resolvable:$true] %s26_s15 }
   0x3   :  { %s28_s17 = sshll.u32 %s1218_s16, 4  ;;  %s53_s20 = sshll.u32 %s1556_s8, 4  ;;  %s29_s17 = int_to_ptr.vmem [resolvable:$true] %s28_s17  ;;  %s54_s20 = int_to_ptr.hbm [resolvable:$true] %s53_s20 }
   0x4   :  { %s1219_s21 = smov 16   ;;  %s1220_s22 = smov 1  }
   0x5   :  { %34 = dma.hbm_to_vmem [thread:$0]  %s27_s15, 32, %s29_s17, [#allocation4], %s1219_s21, %s1219_s21, %s1220_s22  }
   0x6   :  { %s1221_s23 = smov [#allocation6]   ;;  %s1222_s25 = smov 64  }
   0x7   :  { %s55_s24 = sshll.u32 %s1221_s23, 4  ;;  %s1223_s26 = smov 4   ;;  %s56_s24 = int_to_ptr.vmem [resolvable:$true] %s55_s24 }
   0x8   :  { %61 = dma.hbm_to_vmem [thread:$0]  %s54_s20, 256, %s56_s24, [#allocation7], %s1222_s25, %s1222_s25, %s1223_s26  }
   0x9   :  { %1212 = dma.done.wait [#allocation4], 32  }
   0xa   :  { %1213 = vsyncadd [#allocation4], 4294967264 }
   0xb   :  { %1214 = dma.done.wait [#allocation7], 256  }
   0xc   :  { %1215 = vsyncadd [#allocation7], 4294967040  ;;  %v1049_v0 = vld [vmem:[%s1550_s2 + $0x8] sm:$0xff]  ;;  %v1048_v1 = vld [vmem:[%s1550_s2] sm:$0xff]  ;;  %vm104_vm0 = vcmask 261120   ;;  %s1225_s18 = smov 104  }
   0xd   :  { %v1334_v2 = vld [vmem:[%s1549_s1] sm:$0xff]  ;;  %v1339_v3 = vld [vmem:[%s1549_s1 + $0x8] sm:$0xff]  ;;  %114 = vmatpush.bf16.msra.mxu0 %v1049_v0  ;;  %s1224_s1 = smov 96   ;;  %s1226_s19 = smov 120   ;;  %vm137_vm1 = vcmask 64512   ;;  %vm174_vm2 = vcmask 1043456  }
   0xe   :  { %v83_v4 = vpack.c.bf16 %v1339_v3, %v1334_v2  ;;  %v1080_v5 = vld [vmem:[%s1551_s3] ss:$0 sm:$0xff]  ;;  %s1227_s3 = smov 88   ;;  %s1228_s20 = smov 80   ;;  %v1081_v46 = vld [vmem:[#allocation3] ss:$0 sm:$0xff] }
   0xf   :  { %s1229_s22 = smov 72   ;;  %s1230_s23 = smov 112   ;;  %v1082_v59 = vld [vmem:[#allocation3 + $0x1] ss:$0 sm:$0xff]  ;;  %vm255_vm3 = vcmask 130112   ;;  %vm317_vm4 = vcmask 195712  }
  0x10   :  { %s1231_s24 = smov 56   ;;  %s1232_s26 = smov 48   ;;  %vm379_vm5 = vcmask 261312  }
  0x11   :  { %115 = vmatpush.bf16.msra.mxu0 %v1048_v1  ;;  %s1233_s0 = smov 40   ;;  %s1235_s8 = smov 24  }
  0x12   :  { %s974_s29 = sshll.u32 %s1562_s14, 4  ;;  %s975_s29 = int_to_ptr.hbm [resolvable:$true] %s974_s29 }
  0x14   :  { %996 = vmatmul.msk.bf16.vlgmr.msra.gmra.mxu0 %vm104_vm0, %v83_v4 }
  0x91   :  { %v117_v6 = vpop.f32.mrf.mxu0 }
  0x92   :  { %v118_v7 = vadd.f32 %v1080_v5, %v117_v6 }
  0x94   :  { %v122_v8 = vmul.f32 0.35355338, %v118_v7  ;;  %v126_v9 = vpack.c.bf16 %v118_v7, %v118_v7 }
  0x96   :  { %v124_v10 = vpack.c.bf16 %v122_v8, %v122_v8  ;;  %v133_v11 = vunpack.c.l.b16 %v126_v9 }
  0x98   :  { %v1347_v12 = vpack.c.b16 %v133_v11, %v133_v11  ;;  %v193_v13 = vunpack.c.l.b16 %v124_v10 }
  0x99   :  { %v119_v14 = vpop.f32.mrf.mxu0 }
  0x9a   :  { %v120_v15 = vadd.f32 %v1080_v5, %v119_v14  ;;  %135 = vrot.lane.b32.xlu0 %v1347_v12, %s1224_s1  ;;  %v194_v16 = vpack.c.b16 %v193_v13, %v193_v13 }
  0x9c   :  { %319 = vrot.lane.b32.xlu2 %v194_v16, %s1225_s18  ;;  %195 = vrot.lane.b32.xlu1 %v194_v16, %s1226_s19  ;;  %v123_v17 = vmul.f32 0.35355338, %v120_v15  ;;  %v127_v18 = vpack.c.bf16 %v120_v15, %v120_v15 }
  0x9e   :  { %v125_v19 = vpack.c.bf16 %v123_v17, %v123_v17  ;;  %v387_v20 = vunpack.c.l.b16 %v127_v18 }
  0xa0   :  { %v445_v21 = vunpack.c.l.b16 %v125_v19  ;;  %v1353_v22 = vpack.c.b16 %v387_v20, %v387_v20 }
  0xa2   :  { %197 = vrot.lane.b32.xlu0 %v1347_v12, %s1227_s3  ;;  %v446_v23 = vpack.c.b16 %v445_v21, %v445_v21 }
  0xa4   :  { %259 = vrot.lane.b32.xlu2 %v1347_v12, %s1228_s20  ;;  %321 = vrot.lane.b32.xlu1 %v1347_v12, %s1229_s22 }
  0xaa   :  { %449 = vrot.lane.b32.xlu0 %v1353_v22, %s1227_s3 }
  0xac   :  { %447 = vrot.lane.b32.xlu2 %v446_v23, %s1226_s19  ;;  %257 = vrot.lane.b32.xlu1 %v194_v16, %s1230_s23 }
  0xb2   :  { %389 = vrot.lane.b32.xlu0 %v1353_v22, %s1224_s1 }
  0xb4   :  { %569 = vrot.lane.b32.xlu2 %v446_v23, %s1225_s18  ;;  %571 = vrot.lane.b32.xlu1 %v1353_v22, %s1229_s22 }
  0xba   :  { %510 = vrot.lane.b32.xlu0 %v1353_v22, %s1228_s20 }
  0xbc   :  { %508 = vrot.lane.b32.xlu1 %v446_v23, %s1230_s23 }
  0xc4   :  { %230 = vrot.lane.b32.xlu1 %v1347_v12, %s1231_s24 }
  0xf6   :  { %v320_v24 = vpop.permute.xlu2 %319 }
  0xfe   :  { %v260_v25 = vpop.permute.xlu2 %259 }
  0xff   :  { %v265_v26 = vsel %vm137_vm1, %v260_v25, 0 }
 0x100   :  { %274 = vmatpush.bf16.xpose.msrb.mxu0 %v265_v26 }
 0x106   :  { %v448_v43 = vpop.permute.xlu2 %447 }
 0x10c   :  { %v136_v27 = vpop.permute.xlu0 %135 }
 0x10d   :  { %v142_v28 = vsel %vm137_vm1, %v136_v27, 0 }
 0x10e   :  { %151 = vmatpush.bf16.xpose.msra.mxu1 %v142_v28  ;;  %v196_v29 = vpop.permute.xlu1 %195  ;;  %v570_v45 = vpop.permute.xlu2 %569 }
 0x114   :  { %v198_v30 = vpop.permute.xlu0 %197 }
 0x115   :  { %997 = vmatmul.msk.bf16.vlgmr.msra.gmra.mxu1 %vm137_vm1, %v124_v10  ;;  %v203_v31 = vsel %vm137_vm1, %v198_v30, 0 }
 0x116   :  { %212 = vmatpush.bf16.xpose.msra.mxu3 %v203_v31  ;;  %v322_v32 = vpop.permute.xlu1 %321 }
 0x117   :  { %v327_v33 = vsel %vm137_vm1, %v322_v32, 0 }
 0x11c   :  { %v450_v34 = vpop.permute.xlu0 %449 }
 0x11d   :  { %v455_v35 = vsel %vm137_vm1, %v450_v34, 0  ;;  %999 = vmatmul.msk.bf16.vlgmr.msra.gmra.mxu3 %vm137_vm1, %v196_v29 }
 0x11e   :  { %336 = vmatpush.bf16.xpose.msrb.mxu3 %v327_v33  ;;  %v258_v36 = vpop.permute.xlu1 %257 }
 0x11f   :  { %1001 = vmatmul.msk.bf16.vlgmr.msrb.gmra.mxu0 %vm137_vm1, %v258_v36 }
 0x124   :  { %v390_v37 = vpop.permute.xlu0 %389 }
 0x125   :  { %v395_v38 = vsel %vm137_vm1, %v390_v37, 0 }
 0x126   :  { %464 = vmatpush.bf16.xpose.msra.mxu3 %v455_v35  ;;  %404 = vmatpush.bf16.xpose.msra.mxu0 %v395_v38  ;;  %v572_v39 = vpop.permute.xlu1 %571 }
 0x127   :  { %v577_v41 = vsel %vm137_vm1, %v572_v39, 0 }
 0x12c   :  { %v511_v40 = vpop.permute.xlu0 %510 }
 0x12d   :  { %v516_v42 = vsel %vm137_vm1, %v511_v40, 0  ;;  %1003 = vmatmul.msk.bf16.vlgmr.msrb.gmra.mxu3 %vm137_vm1, %v320_v24 }
 0x12e   :  { %586 = vmatpush.bf16.xpose.msrb.mxu3 %v577_v41  ;;  %525 = vmatpush.bf16.xpose.msrb.mxu0 %v516_v42  ;;  %v509_v44 = vpop.permute.xlu1 %508 }
 0x12f   :  { %1005 = vmatmul.msk.bf16.vlgmr.msra.gmra.mxu0 %vm137_vm1, %v125_v19 }
 0x136   :  { %v231_v30 = vpop.permute.xlu1 %230 }
 0x137   :  { %v236_v34 = vsel %vm174_vm2, %v231_v30, 0 }
 0x13d   :  { %1007 = vmatmul.msk.bf16.vlgmr.msra.gmra.mxu3 %vm137_vm1, %v448_v43 }
 0x13f   :  { %1009 = vmatmul.msk.bf16.vlgmr.msrb.gmra.mxu0 %vm137_vm1, %v509_v44 }
 0x14d   :  { %1011 = vmatmul.msk.bf16.vlgmr.msrb.gmra.mxu3 %vm137_vm1, %v570_v45 }
 0x192   :  { %v153_v47 = vpop.f32.mrf.mxu1 }
 0x193   :  { %v154_v48 = vadd.f32 %v1081_v46, %v153_v47 }
 0x195   :  { %v157_v49 = vsel %vm137_vm1, %v154_v48, -inf }
 0x196   :  { %158 = vmax.xlane.f32.xlu2 %v157_v49 }
 0x19a   :  { %v155_v50 = vpop.f32.mrf.mxu1 }
 0x19c   :  { %v276_v51 = vpop.f32.mrf.mxu0 }
 0x19d   :  { %v277_v52 = vadd.f32 %v1081_v46, %v276_v51 }
 0x19f   :  { %v280_v53 = vsel %vm137_vm1, %v277_v52, -inf }
 0x1a0   :  { %v214_v54 = vpop.f32.mrf.mxu3  ;;  %281 = vmax.xlane.f32.xlu2 %v280_v53 }
 0x1a1   :  { %v215_v55 = vadd.f32 %v1081_v46, %v214_v54 }
 0x1a3   :  { %v218_v56 = vsel %vm137_vm1, %v215_v55, -inf }
 0x1a4   :  { %219 = vmax.xlane.f32.xlu0 %v218_v56  ;;  %v278_v57 = vpop.f32.mrf.mxu0 }
 0x1a8   :  { %v216_v58 = vpop.f32.mrf.mxu3 }
 0x1ac   :  { %v406_v60 = vpop.f32.mrf.mxu0 }
 0x1ad   :  { %v1380_v61 = vadd.f32 %v1082_v59, %v406_v60 }
 0x1af   :  { %v410_v62 = vsel %vm137_vm1, %v1380_v61, -inf }
 0x1b0   :  { %v338_v63 = vpop.f32.mrf.mxu3  ;;  %411 = vmax.xlane.f32.xlu1 %v410_v62 }
 0x1b1   :  { %v1384_v0 = vadd.f32 %v1081_v46, %v338_v63 }
 0x1b3   :  { %v342_v4 = vsel %vm137_vm1, %v1384_v0, -inf }
 0x1b4   :  { %v408_v1 = vpop.f32.mrf.mxu0 }
 0x1b8   :  { %v340_v5 = vpop.f32.mrf.mxu3  ;;  %343 = vmax.xlane.f32.xlu1 %v342_v4  ;;  %169 = vrot.lane.b32.xlu2 %v1347_v12, %s1222_s25 }
 0x1bc   :  { %v527_v6 = vpop.f32.mrf.mxu0 }
 0x1bd   :  { %v1390_v7 = vadd.f32 %v1082_v59, %v527_v6 }
 0x1bf   :  { %v531_v8 = vsel %vm137_vm1, %v1390_v7, -inf }
 0x1c0   :  { %v466_v9 = vpop.f32.mrf.mxu3  ;;  %532 = vmax.xlane.f32.xlu0 %v531_v8 }
 0x1c1   :  { %v467_v17 = vadd.f32 %v1082_v59, %v466_v9 }
 0x1c3   :  { %v470_v18 = vsel %vm137_vm1, %v467_v17, -inf }
 0x1c4   :  { %v529_v10 = vpop.f32.mrf.mxu0 }
 0x1c8   :  { %v468_v11 = vpop.f32.mrf.mxu3 }
 0x1d0   :  { %v588_v13 = vpop.f32.mrf.mxu3 }
 0x1d1   :  { %v589_v14 = vadd.f32 %v1082_v59, %v588_v13  ;;  %292 = vrot.lane.b32.xlu1 %v1347_v12, %s1232_s26 }
 0x1d3   :  { %v592_v15 = vsel %vm137_vm1, %v589_v14, -inf }
 0x1d4   :  { %593 = vmax.xlane.f32.xlu0 %v592_v15 }
 0x1d8   :  { %v590_v16 = vpop.f32.mrf.mxu3 }
 0x1e1   :  { %471 = vmax.xlane.f32.xlu2 %v470_v18 }
 0x209   :  { %v159_v19 = vpop.xlane.xlu2 %158 }
 0x20a   :  { %v160_v20 = vsub.f32 %v154_v48, %v159_v19 }
 0x20c   :  { %v161_v21 = vmul.f32 1.442695, %v160_v20 }
 0x20e   :  { %1090 = vpow2.f32 %v161_v21 }
 0x213   :  { %v282_v23 = vpop.xlane.xlu2 %281 }
 0x214   :  { %v1398_v24 = vpop.eup %1090  ;;  %v283_v25 = vsub.f32 %v277_v52, %v282_v23 }
 0x215   :  { %v163_v26 = vsel %vm137_vm1, %v1398_v24, 0.0 }
 0x216   :  { %v284_v27 = vmul.f32 1.442695, %v283_v25  ;;  %164 = vadd.xlane.f32.xlu0 %v163_v26 }
 0x217   :  { %v220_v28 = vpop.xlane.xlu0 %219 }
 0x218   :  { %1092 = vpow2.f32 %v284_v27  ;;  %v221_v29 = vsub.f32 %v215_v55, %v220_v28 }
 0x21a   :  { %v222_v31 = vmul.f32 1.442695, %v221_v29 }
 0x21b   :  { %v170_v32 = vpop.permute.xlu2 %169 }
 0x21c   :  { %1094 = vpow2.f32 %v222_v31  ;;  %v176_v33 = vsel %vm174_vm2, %v170_v32, 0 }
 0x21d   :  { %185 = vmatpush.bf16.msra.mxu2 %v176_v33 }
 0x21e   :  { %v1093_v35 = vpop.eup %1092 }
 0x21f   :  { %v286_v36 = vsel %vm137_vm1, %v1093_v35, 0.0 }
 0x220   :  { %287 = vadd.xlane.f32.xlu2 %v286_v36 }
 0x221   :  { %245 = vmatpush.bf16.msrb.mxu2 %v236_v34 }
 0x222   :  { %v1405_v37 = vpop.eup %1094 }
 0x223   :  { %v224_v38 = vsel %vm137_vm1, %v1405_v37, 0.0  ;;  %v412_v39 = vpop.xlane.xlu1 %411 }
 0x224   :  { %225 = vadd.xlane.f32.xlu1 %v224_v38  ;;  %v413_v41 = vsub.f32 %v1380_v61, %v412_v39 }
 0x226   :  { %v414_v44 = vmul.f32 1.442695, %v413_v41 }
 0x228   :  { %1096 = vpow2.f32 %v414_v44 }
 0x22a   :  { %354 = vrot.lane.b32.xlu0 %v1347_v12, %s1233_s0 }
 0x22b   :  { %v344_v40 = vpop.xlane.xlu1 %343 }
 0x22c   :  { %v345_v46 = vsub.f32 %v1384_v0, %v344_v40 }
 0x22e   :  { %v346_v12 = vmul.f32 1.442695, %v345_v46  ;;  %v1097_v49 = vpop.eup %1096 }
 0x22f   :  { %v416_v52 = vsel %vm137_vm1, %v1097_v49, 0.0 }
 0x230   :  { %1098 = vpow2.f32 %v346_v12 }
 0x233   :  { %v533_v45 = vpop.xlane.xlu0 %532 }
 0x234   :  { %v534_v47 = vsub.f32 %v1390_v7, %v533_v45 }
 0x236   :  { %v535_v51 = vmul.f32 1.442695, %v534_v47  ;;  %v1099_v56 = vpop.eup %1098 }
 0x237   :  { %v348_v58 = vsel %vm137_vm1, %v1099_v56, 0.0 }
 0x238   :  { %482 = vrot.lane.b32.xlu2 %v1353_v22, %s1231_s24  ;;  %1100 = vpow2.f32 %v535_v51 }
 0x23d   :  { %422 = vrot.lane.b32.xlu1 %v1353_v22, %s1222_s25  ;;  %s1234_s25 = smov 8  }
 0x23e   :  { %v1421_v59 = vpop.eup %1100 }
 0x23f   :  { %v537_v61 = vsel %vm137_vm1, %v1421_v59, 0.0 }
 0x243   :  { %v293_v42 = vpop.permute.xlu1 %292 }
 0x244   :  { %v298_v43 = vsel %vm174_vm2, %v293_v42, 0 }
 0x245   :  { %307 = vmatpush.bf16.msrb.mxu1 %v298_v43 }
 0x247   :  { %v594_v48 = vpop.xlane.xlu0 %593 }
 0x248   :  { %v595_v50 = vsub.f32 %v589_v14, %v594_v48 }
 0x24a   :  { %v596_v55 = vmul.f32 1.442695, %v595_v50 }
 0x24c   :  { %1102 = vpow2.f32 %v596_v55 }
 0x252   :  { %v1423_v60 = vpop.eup %1102 }
 0x253   :  { %v598_v63 = vsel %vm137_vm1, %v1423_v60, 0.0 }
 0x254   :  { %417 = vadd.xlane.f32.xlu0 %v416_v52  ;;  %v472_v53 = vpop.xlane.xlu2 %471 }
 0x255   :  { %v473_v54 = vsub.f32 %v467_v17, %v472_v53 }
 0x257   :  { %v474_v57 = vmul.f32 1.442695, %v473_v54 }
 0x259   :  { %1104 = vpow2.f32 %v474_v57 }
 0x25c   :  { %349 = vadd.xlane.f32.xlu0 %v348_v58 }
 0x25f   :  { %v1105_v62 = vpop.eup %1104 }
 0x260   :  { %v476_v0 = vsel %vm137_vm1, %v1105_v62, 0.0 }
 0x261   :  { %538 = vadd.xlane.f32.xlu2 %v537_v61 }
 0x264   :  { %599 = vadd.xlane.f32.xlu0 %v598_v63 }
 0x267   :  { %477 = vadd.xlane.f32.xlu1 %v476_v0  ;;  %v1051_v0 = vld [vmem:[%s1552_s4 + $0x8] sm:$0xff] }
 0x268   :  { %662 = vmatpush.bf16.msra.mxu0 %v1051_v0 }
 0x278   :  { %604 = vrot.lane.b32.xlu0 %v1353_v22, %s1233_s0 }
 0x280   :  { %543 = vrot.lane.b32.xlu1 %v1353_v22, %s1232_s26 }
 0x289   :  { %v165_v1 = vpop.xlane.xlu0 %164 }
 0x28a   :  { %1106 = vrcp.f32 %v165_v1  ;;  %v1050_v1 = vld [vmem:[%s1552_s4] sm:$0xff] }
 0x28b   :  { %663 = vmatpush.bf16.msra.mxu0 %v1050_v1  ;;  %v1086_v1 = vld [vmem:[%s1557_s9] ss:$0 sm:$0xff] }
 0x290   :  { %v1107_v4 = vpop.eup %1106 }
 0x291   :  { %v167_v5 = vmul.f32 %v1107_v4, %v1398_v24 }
 0x293   :  { %v288_v6 = vpop.xlane.xlu2 %287  ;;  %v168_v7 = vpack.c.bf16 %v167_v5, %v167_v5 }
 0x294   :  { %1108 = vrcp.f32 %v288_v6 }
 0x295   :  { %998 = vmatmul.msk.bf16.vlgmr.msra.gmra.mxu2 %vm137_vm1, %v168_v7 }
 0x297   :  { %v226_v8 = vpop.xlane.xlu1 %225 }
 0x298   :  { %1110 = vrcp.f32 %v226_v8 }
 0x29a   :  { %v1109_v9 = vpop.eup %1108 }
 0x29b   :  { %v290_v10 = vmul.f32 %v1109_v9, %v1093_v35  ;;  %v483_v16 = vpop.permute.xlu2 %482 }
 0x29c   :  { %v355_v11 = vpop.permute.xlu0 %354  ;;  %v488_v18 = vsel %vm174_vm2, %v483_v16, 0 }
 0x29d   :  { %v360_v13 = vsel %vm174_vm2, %v355_v11, 0  ;;  %v291_v14 = vpack.c.bf16 %v290_v10, %v290_v10  ;;  %v1083_v10 = vld [vmem:[%s1553_s5] ss:$0 sm:$0xff] }
 0x29e   :  { %v1111_v15 = vpop.eup %1110  ;;  %369 = vmatpush.bf16.msra.mxu2 %v360_v13 }
 0x29f   :  { %v228_v22 = vmul.f32 %v1111_v15, %v1405_v37  ;;  %1002 = vmatmul.msk.bf16.vlgmr.msrb.gmra.mxu1 %vm137_vm1, %v291_v14 }
 0x2a1   :  { %v229_v17 = vpack.c.bf16 %v228_v22, %v228_v22 }
 0x2a5   :  { %1000 = vmatmul.msk.bf16.vlgmr.msrb.gmra.mxu2 %vm137_vm1, %v229_v17 }
 0x2a6   :  { %497 = vmatpush.bf16.msrb.mxu2 %v488_v18 }
 0x2af   :  { %v423_v19 = vpop.permute.xlu1 %422 }
 0x2b0   :  { %v428_v20 = vsel %vm174_vm2, %v423_v19, 0  ;;  %v1236_v19 = vmov 32.0  }
 0x2b1   :  { %437 = vmatpush.bf16.msra.mxu1 %v428_v20 }
 0x2c7   :  { %v418_v21 = vpop.xlane.xlu0 %417 }
 0x2c8   :  { %1112 = vrcp.f32 %v418_v21 }
 0x2ce   :  { %v1113_v23 = vpop.eup %1112 }
 0x2cf   :  { %v420_v24 = vmul.f32 %v1113_v23, %v1097_v49  ;;  %v350_v25 = vpop.xlane.xlu0 %349 }
 0x2d0   :  { %1114 = vrcp.f32 %v350_v25 }
 0x2d1   :  { %v421_v26 = vpack.c.bf16 %v420_v24, %v420_v24 }
 0x2d3   :  { %1006 = vmatmul.msk.bf16.vlgmr.msra.gmra.mxu1 %vm137_vm1, %v421_v26 }
 0x2d4   :  { %v539_v33 = vpop.xlane.xlu2 %538 }
 0x2d6   :  { %v1115_v27 = vpop.eup %1114 }
 0x2d7   :  { %v352_v28 = vmul.f32 %v1115_v27, %v1099_v56  ;;  %v600_v32 = vpop.xlane.xlu0 %599 }
 0x2d9   :  { %v353_v29 = vpack.c.bf16 %v352_v28, %v352_v28 }
 0x2da   :  { %v478_v30 = vpop.xlane.xlu1 %477 }
 0x2db   :  { %1004 = vmatmul.msk.bf16.vlgmr.msra.gmra.mxu2 %vm137_vm1, %v353_v29  ;;  %1116 = vrcp.f32 %v478_v30 }
 0x2dc   :  { %1118 = vrcp.f32 %v539_v33 }
 0x2dd   :  { %1120 = vrcp.f32 %v600_v32 }
 0x2de   :  { %1122 = vrcp.f32 %v1236_v19 }
 0x2e1   :  { %v1117_v31 = vpop.eup %1116 }
 0x2e2   :  { %v480_v34 = vmul.f32 %v1117_v31, %v1105_v62  ;;  %v1119_v38 = vpop.eup %1118 }
 0x2e3   :  { %v541_v39 = vmul.f32 %v1119_v38, %v1421_v59  ;;  %v1121_v40 = vpop.eup %1120 }
 0x2e4   :  { %v481_v35 = vpack.c.bf16 %v480_v34, %v480_v34  ;;  %v602_v44 = vmul.f32 %v1121_v40, %v1423_v60  ;;  %v1123_v20 = vpop.eup %1122 }
 0x2e5   :  { %v542_v43 = vpack.c.bf16 %v541_v39, %v541_v39  ;;  %v681_v21 = vmul.f32 32.0, %v1123_v20  ;;  %vm685_vm6 = vweird.f32 %v1123_v20  ;;  %v1052_v39 = vld [vmem:[#allocation6] sm:$0xff] }
 0x2e6   :  { %v603_v45 = vpack.c.bf16 %v602_v44, %v602_v44 }
 0x2e7   :  { %v682_v23 = vsub.f32 1.0, %v681_v21 }
 0x2e9   :  { %v683_v24 = vmul.f32 %v1123_v20, %v682_v23 }
 0x2ea   :  { %v605_v36 = vpop.permute.xlu0 %604 }
 0x2eb   :  { %v610_v37 = vsel %vm174_vm2, %v605_v36, 0  ;;  %1008 = vmatmul.msk.bf16.vlgmr.msrb.gmra.mxu2 %vm137_vm1, %v481_v35  ;;  %v684_v25 = vadd.f32 %v1123_v20, %v683_v24  ;;  %v1053_v35 = vld [vmem:[#allocation6 + $0x8] sm:$0xff]  ;;  %v1056_v24 = vld [vmem:[%s1558_s10 + $0x10] sm:$0xff] }
 0x2ec   :  { %619 = vmatpush.bf16.msra.mxu2 %v610_v37 }
 0x2ed   :  { %v1471_v26 = vsel %vm685_vm6, %v1123_v20, %v684_v25 }
 0x2f2   :  { %v544_v41 = vpop.permute.xlu1 %543 }
 0x2f3   :  { %v549_v42 = vsel %vm174_vm2, %v544_v41, 0 }
 0x2f4   :  { %558 = vmatpush.bf16.msrb.mxu1 %v549_v42 }
 0x2f7   :  { %1010 = vmatmul.msk.bf16.vlgmr.msrb.gmra.mxu1 %vm137_vm1, %v542_v43 }
 0x2f8   :  { %765 = vmatpush.bf16.msra.mxu1 %v1053_v35 }
 0x2fb   :  { %1012 = vmatmul.msk.bf16.vlgmr.msra.gmra.mxu2 %vm137_vm1, %v603_v45 }
 0x2fc   :  { %766 = vmatpush.bf16.msra.mxu1 %v1052_v39 }
 0x318   :  { %v187_v46 = vpop.f32.mrf.mxu2 }
 0x319   :  { %191 = vst.msk [vmem:[#allocation2] sm:$0xff] %vm137_vm1, %v187_v46 }
 0x31c   :  { %v309_v12 = vpop.f32.mrf.mxu1 }
 0x31d   :  { %314 = vrot.lane.b32.xlu0 %v309_v12, %s1219_s21 }
 0x320   :  { %v189_v47 = vpop.f32.mrf.mxu2 }
 0x324   :  { %v311_v48 = vpop.f32.mrf.mxu1 }
 0x328   :  { %v247_v49 = vpop.f32.mrf.mxu2 }
 0x329   :  { %252 = vrot.lane.b32.xlu0 %v247_v49, %s1234_s25 }
 0x330   :  { %v249_v50 = vpop.f32.mrf.mxu2 }
 0x350   :  { %v439_v51 = vpop.f32.mrf.mxu1 }
 0x351   :  { %443 = vst.msk [vmem:[#allocation2 + $0x8] sm:$0xff] %vm137_vm1, %v439_v51 }
 0x358   :  { %v441_v52 = vpop.f32.mrf.mxu1 }
 0x35e   :  { %v371_v53 = vpop.f32.mrf.mxu2 }
 0x35f   :  { %376 = vrot.lane.b32.xlu2 %v371_v53, %s1235_s8 }
 0x366   :  { %v373_v54 = vpop.f32.mrf.mxu2 }
 0x367   :  { %v1084_v54 = vld [vmem:[%s1554_s6] ss:$0 sm:$0xff] }
 0x36e   :  { %v499_v55 = vpop.f32.mrf.mxu2 }
 0x36f   :  { %504 = vrot.lane.b32.xlu1 %v499_v55, %s1234_s25 }
 0x374   :  { %v560_v56 = vpop.f32.mrf.mxu1 }
 0x376   :  { %v501_v57 = vpop.f32.mrf.mxu2 }
 0x377   :  { %565 = vrot.lane.b32.xlu1 %v560_v56, %s1219_s21 }
 0x37c   :  { %v562_v58 = vpop.f32.mrf.mxu1 }
 0x37d   :  { %v1085_v58 = vld [vmem:[%s1555_s7] ss:$0 sm:$0xff] }
 0x37e   :  { %v621_v59 = vpop.f32.mrf.mxu2 }
 0x37f   :  { %626 = vrot.lane.b32.xlu0 %v621_v59, %s1235_s8 }
 0x386   :  { %v623_v60 = vpop.f32.mrf.mxu2 }
 0x38f   :  { %v315_v61 = vpop.permute.xlu0 %314 }
 0x39b   :  { %v253_v62 = vpop.permute.xlu0 %252 }
 0x39c   :  { %256 = vst.msk [vmem:[#allocation2] sm:$0xff] %vm255_vm3, %v253_v62 }
 0x39d   :  { %318 = vst.msk [vmem:[#allocation2] sm:$0xff] %vm317_vm4, %v315_v61 }
 0x3b9   :  { %v377_v63 = vpop.permute.xlu2 %376 }
 0x3ba   :  { %380 = vst.msk [vmem:[#allocation2] sm:$0xff] %vm379_vm5, %v377_v63 }
 0x3c1   :  { %v630_v7 = vld [vmem:[#allocation2] sm:$0xff] }
 0x3e1   :  { %v505_v4 = vpop.permute.xlu1 %504 }
 0x3e2   :  { %507 = vst.msk [vmem:[#allocation2 + $0x8] sm:$0xff] %vm255_vm3, %v505_v4 }
 0x3e9   :  { %v566_v5 = vpop.permute.xlu1 %565 }
 0x3ea   :  { %568 = vst.msk [vmem:[#allocation2 + $0x8] sm:$0xff] %vm317_vm4, %v566_v5 }
 0x3f1   :  { %v627_v6 = vpop.permute.xlu0 %626 }
 0x3f2   :  { %629 = vst.msk [vmem:[#allocation2 + $0x8] sm:$0xff] %vm379_vm5, %v627_v6 }
 0x3f9   :  { %v631_v8 = vld [vmem:[#allocation2 + $0x8] sm:$0xff] }
 0x3fa   :  { %v632_v9 = vpack.c.bf16 %v631_v8, %v630_v7 }
 0x3fc   :  { %1021 = vmatmul.msk.bf16.vlgmr.msra.gmra.mxu0 %vm104_vm0, %v632_v9 }
 0x479   :  { %v665_v11 = vpop.f32.mrf.mxu0 }
 0x47a   :  { %v666_v13 = vadd.f32 %v1083_v10, %v665_v11 }
 0x47c   :  { %v670_v14 = vadd.f32 %v666_v13, %v1334_v2 }
 0x47e   :  { %v674_v15 = vsel %vm104_vm0, %v670_v14, 0.0 }
 0x47f   :  { %675 = vadd.xlane.f32.xlu1 %v674_v15 }
 0x481   :  { %v667_v22 = vpop.f32.mrf.mxu0 }
 0x482   :  { %v668_v16 = vadd.f32 %v1083_v10, %v667_v22 }
 0x484   :  { %v671_v17 = vadd.f32 %v668_v16, %v1339_v3 }
 0x486   :  { %v677_v18 = vsel %vm104_vm0, %v671_v17, 0.0 }
 0x487   :  { %678 = vadd.xlane.f32.xlu0 %v677_v18  ;;  %v1057_v18 = vld [vmem:[%s1558_s10 + $0x18] sm:$0xff] }
 0x488   :  { %898 = vmatpush.bf16.msra.mxu3 %v1057_v18 }
 0x48c   :  { %899 = vmatpush.bf16.msra.mxu3 %v1056_v24 }
 0x4f2   :  { %v676_v2 = vpop.xlane.xlu1 %675 }
 0x4f3   :  { %v687_v27 = vmul.f32 %v1471_v26, %v676_v2 }
 0x4f5   :  { %v689_v28 = vsub.f32 %v670_v14, %v687_v27 }
 0x4f7   :  { %v691_v29 = vmul.f32 %v689_v28, %v689_v28 }
 0x4f9   :  { %v693_v3 = vsel %vm104_vm0, %v691_v29, 0.0 }
 0x4fa   :  { %v679_v30 = vpop.xlane.xlu0 %678  ;;  %694 = vadd.xlane.f32.xlu2 %v693_v3 }
 0x4fb   :  { %v688_v31 = vmul.f32 %v1471_v26, %v679_v30  ;;  %v1055_v30 = vld [vmem:[%s1558_s10 + $0x8] sm:$0xff] }
 0x4fc   :  { %900 = vmatpush.bf16.msra.mxu3 %v1055_v30 }
 0x4fd   :  { %v690_v32 = vsub.f32 %v671_v17, %v688_v31 }
 0x4ff   :  { %v692_v33 = vmul.f32 %v690_v32, %v690_v32 }
 0x501   :  { %v696_v34 = vsel %vm104_vm0, %v692_v33, 0.0 }
 0x502   :  { %697 = vadd.xlane.f32.xlu1 %v696_v34 }
 0x56d   :  { %v695_v36 = vpop.xlane.xlu2 %694 }
 0x56e   :  { %v699_v37 = vmul.f32 %v695_v36, %v1471_v26 }
 0x570   :  { %v701_v38 = vadd.f32 1e-05, %v699_v37 }
 0x572   :  { %1124 = vrsqrt.f32 %v701_v38  ;;  %vm709_vm8 = vweird.f32 %v701_v38 }
 0x575   :  { %v698_v40 = vpop.xlane.xlu1 %697 }
 0x576   :  { %v700_v41 = vmul.f32 %v698_v40, %v1471_v26 }
 0x578   :  { %v1125_v42 = vpop.eup %1124  ;;  %v702_v43 = vadd.f32 1e-05, %v700_v41 }
 0x579   :  { %v704_v44 = vmul.f32 %v1125_v42, %v701_v38  ;;  %vm710_vm7 = vweird.f32 %v1125_v42  ;;  %v1054_v38 = vld [vmem:[%s1558_s10] sm:$0xff] }
 0x57a   :  { %1126 = vrsqrt.f32 %v702_v43  ;;  %vm711_vm9 = vmor %vm709_vm8, %vm710_vm7  ;;  %vm719_vm11 = vweird.f32 %v702_v43  ;;  %901 = vmatpush.bf16.msra.mxu3 %v1054_v38  ;;  %vm890_vm8 = vcmask 523264  }
 0x57b   :  { %v705_v45 = vmul.f32 %v1125_v42, %v704_v44 }
 0x57d   :  { %v706_v46 = vmul.f32 0.5, %v705_v45 }
 0x57f   :  { %v707_v12 = vsub.f32 1.5, %v706_v46 }
 0x580   :  { %v1127_v47 = vpop.eup %1126 }
 0x581   :  { %v708_v48 = vmul.f32 %v1125_v42, %v707_v12  ;;  %v714_v49 = vmul.f32 %v1127_v47, %v702_v43  ;;  %vm720_vm10 = vweird.f32 %v1127_v47 }
 0x582   :  { %vm721_vm12 = vmor %vm719_vm11, %vm720_vm10 }
 0x583   :  { %v715_v50 = vmul.f32 %v1127_v47, %v714_v49  ;;  %v712_v51 = vsel %vm711_vm9, %v1125_v42, %v708_v48 }
 0x584   :  { %v723_v55 = vmul.f32 %v712_v51, %v689_v28 }
 0x585   :  { %v716_v52 = vmul.f32 0.5, %v715_v50 }
 0x586   :  { %v728_v59 = vmul.f32 %v1084_v54, %v723_v55 }
 0x587   :  { %v717_v53 = vsub.f32 1.5, %v716_v52 }
 0x588   :  { %v1485_v62 = vadd.f32 %v1085_v58, %v728_v59 }
 0x589   :  { %v718_v56 = vmul.f32 %v1127_v47, %v717_v53 }
 0x58b   :  { %v722_v57 = vsel %vm721_vm12, %v1127_v47, %v718_v56 }
 0x58c   :  { %v724_v60 = vmul.f32 %v722_v57, %v690_v32 }
 0x58e   :  { %v729_v61 = vmul.f32 %v1084_v54, %v724_v60 }
 0x590   :  { %v1487_v63 = vadd.f32 %v1085_v58, %v729_v61 }
 0x592   :  { %v735_v0 = vpack.c.bf16 %v1487_v63, %v1485_v62 }
 0x594   :  { %1030 = vmatmul.msk.bf16.vlgmr.msra.gmra.mxu1 %vm104_vm0, %v735_v0 }
 0x611   :  { %v768_v4 = vpop.f32.mrf.mxu1 }
 0x612   :  { %v1495_v5 = vadd.f32 %v1086_v1, %v768_v4 }
 0x614   :  { %v1498_v6 = vmul.f32 0.70710677, %v1495_v5 }
 0x616   :  { %v781_v7 = vand.u32 2147483647, %v1498_v6  ;;  %vm777_vm6 = vcmp.ge.f32.partialorder %v1498_v6, 0.0 }
 0x618   :  { %v783_v8 = vmul.f32 0.3275911, %v781_v7  ;;  %v835_v32 = vsub.f32 0.0, %v781_v7 }
 0x619   :  { %v770_v9 = vpop.f32.mrf.mxu1 }
 0x61a   :  { %v785_v10 = vadd.f32 1.0, %v783_v8  ;;  %v1501_v11 = vadd.f32 %v1086_v1, %v770_v9  ;;  %v837_v40 = vmul.f32 %v835_v32, %v781_v7  ;;  %v1237_v9 = vmov -1.0  }
 0x61c   :  { %1128 = vrcp.f32 %v785_v10  ;;  %v1504_v13 = vmul.f32 0.70710677, %v1501_v11  ;;  %v798_v20 = vand.u32 2147483648, %v785_v10  ;;  %v796_v23 = vand.u32 2147483647, %v785_v10 }
 0x61d   :  { %vm792_vm14 = vweird.f32 %v785_v10  ;;  %v839_v46 = vmul.f32 1.442695, %v837_v40 }
 0x61e   :  { %v782_v14 = vand.u32 2147483647, %v1504_v13  ;;  %v799_v2 = vor.u32 1.1754944e-38, %v798_v20  ;;  %vm797_vm1 = vcmp.eq.f32.partialorder %v796_v23, 8.507059e+37  ;;  %vm778_vm7 = vcmp.ge.f32.partialorder %v1504_v13, 0.0 }
 0x61f   :  { %v774_v20 = vmul.f32 0.5, %v1501_v11 }
 0x620   :  { %v784_v15 = vmul.f32 0.3275911, %v782_v14  ;;  %v836_v47 = vsub.f32 0.0, %v782_v14 }
 0x622   :  { %v1129_v22 = vpop.eup %1128  ;;  %v786_v17 = vadd.f32 1.0, %v784_v15  ;;  %v838_v52 = vmul.f32 %v836_v47, %v782_v14 }
 0x623   :  { %v788_v16 = vmul.f32 %v1129_v22, %v785_v10  ;;  %vm793_vm13 = vweird.f32 %v1129_v22  ;;  %v779_v10 = vsel %vm777_vm6, 1.0, %v1237_v9 }
 0x624   :  { %1130 = vrcp.f32 %v786_v17  ;;  %vm794_vm15 = vmor %vm792_vm14, %vm793_vm13  ;;  %v813_v35 = vand.u32 2147483648, %v786_v17  ;;  %v811_v37 = vand.u32 2147483647, %v786_v17  ;;  %vm807_vm3 = vweird.f32 %v786_v17 }
 0x625   :  { %v789_v19 = vsub.f32 1.0, %v788_v16  ;;  %1132 = vpow2.f32 %v839_v46  ;;  %v841_v57 = vmul.f32 1.442695, %v838_v52  ;;  %v780_v16 = vsel %vm778_vm7, 1.0, %v1237_v9 }
 0x626   :  { %v814_v43 = vor.u32 1.1754944e-38, %v813_v35  ;;  %vm812_vm5 = vcmp.eq.f32.partialorder %v811_v37, 8.507059e+37 }
 0x627   :  { %v790_v21 = vmul.f32 %v1129_v22, %v789_v19  ;;  %1134 = vpow2.f32 %v841_v57  ;;  %v773_v19 = vmul.f32 0.5, %v1495_v5 }
 0x629   :  { %v791_v25 = vadd.f32 %v1129_v22, %v790_v21 }
 0x62a   :  { %v1131_v27 = vpop.eup %1130 }
 0x62b   :  { %v795_v28 = vsel %vm794_vm15, %v1129_v22, %v791_v25  ;;  %v803_v3 = vmul.f32 %v1131_v27, %v786_v17  ;;  %vm808_vm2 = vweird.f32 %v1131_v27  ;;  %v1133_v59 = vpop.eup %1132  ;;  %v1087_v25 = vld [vmem:[%s1559_s11] ss:$0 sm:$0xff] }
 0x62c   :  { %v800_v29 = vsel %vm797_vm1, %v799_v2, %v795_v28  ;;  %vm809_vm4 = vmor %vm807_vm3, %vm808_vm2 }
 0x62d   :  { %v817_v31 = vmul.f32 1.0614054, %v800_v29  ;;  %v804_v33 = vsub.f32 1.0, %v803_v3  ;;  %v1135_v8 = vpop.eup %1134 }
 0x62f   :  { %v819_v34 = vadd.f32 -1.4531521, %v817_v31  ;;  %v805_v36 = vmul.f32 %v1131_v27, %v804_v33 }
 0x631   :  { %v821_v39 = vmul.f32 %v819_v34, %v800_v29  ;;  %v806_v41 = vadd.f32 %v1131_v27, %v805_v36 }
 0x633   :  { %v823_v42 = vadd.f32 1.4214138, %v821_v39  ;;  %v810_v44 = vsel %vm809_vm4, %v1131_v27, %v806_v41 }
 0x634   :  { %v815_v12 = vsel %vm812_vm5, %v814_v43, %v810_v44 }
 0x635   :  { %v825_v45 = vmul.f32 %v823_v42, %v800_v29  ;;  %v818_v48 = vmul.f32 1.0614054, %v815_v12 }
 0x637   :  { %v827_v49 = vadd.f32 -0.28449672, %v825_v45  ;;  %v820_v50 = vadd.f32 -1.4531521, %v818_v48 }
 0x639   :  { %v829_v51 = vmul.f32 %v827_v49, %v800_v29  ;;  %v822_v53 = vmul.f32 %v820_v50, %v815_v12 }
 0x63b   :  { %v831_v54 = vadd.f32 0.2548296, %v829_v51  ;;  %v824_v55 = vadd.f32 1.4214138, %v822_v53  ;;  %v1088_v51 = vld [vmem:[%s1560_s12] ss:$0 sm:$0xff] }
 0x63c   :  { %s1238_s12 = smov [#allocation8]  }
 0x63d   :  { %v833_v56 = vmul.f32 %v831_v54, %v800_v29  ;;  %v826_v58 = vmul.f32 %v824_v55, %v815_v12  ;;  %s972_s8 = sshll.u32 %s1238_s12, 4  ;;  %s973_s8 = int_to_ptr.vmem [resolvable:$true] %s972_s8 }
 0x63f   :  { %v843_v60 = vmul.f32 %v1133_v59, %v833_v56  ;;  %v828_v61 = vadd.f32 -0.28449672, %v826_v58 }
 0x641   :  { %v830_v0 = vmul.f32 %v828_v61, %v815_v12  ;;  %v845_v1 = vsub.f32 1.0, %v843_v60 }
 0x643   :  { %v832_v4 = vadd.f32 0.2548296, %v830_v0  ;;  %v847_v14 = vmul.f32 %v845_v1, %v779_v10 }
 0x645   :  { %v834_v7 = vmul.f32 %v832_v4, %v815_v12  ;;  %v849_v17 = vadd.f32 1.0, %v847_v14 }
 0x647   :  { %v844_v15 = vmul.f32 %v1135_v8, %v834_v7  ;;  %v851_v6 = vmul.f32 %v849_v17, %v773_v19 }
 0x649   :  { %v846_v22 = vsub.f32 1.0, %v844_v15 }
 0x64b   :  { %v848_v18 = vmul.f32 %v846_v22, %v780_v16 }
 0x64d   :  { %v850_v21 = vadd.f32 1.0, %v848_v18 }
 0x64f   :  { %v852_v23 = vmul.f32 %v850_v21, %v774_v20 }
 0x651   :  { %v853_v24 = vpack.c.bf16 %v852_v23, %v851_v6 }
 0x653   :  { %1047 = vmatmul.msk.bf16.vlgmr.msra.gmra.mxu3 %vm890_vm8, %v853_v24 }
 0x6d6   :  { %v903_v13 = vpop.f32.mrf.mxu3 }
 0x6d7   :  { %v904_v2 = vadd.f32 %v1087_v25, %v903_v13 }
 0x6d9   :  { %v908_v27 = vadd.f32 %v904_v2, %v1485_v62 }
 0x6db   :  { %v912_v28 = vsel %vm104_vm0, %v908_v27, 0.0 }
 0x6dc   :  { %913 = vadd.xlane.f32.xlu0 %v912_v28 }
 0x6de   :  { %v905_v5 = vpop.f32.mrf.mxu3 }
 0x6df   :  { %v906_v29 = vadd.f32 %v1087_v25, %v905_v5 }
 0x6e1   :  { %v909_v11 = vadd.f32 %v906_v29, %v1487_v63 }
 0x6e3   :  { %v915_v3 = vsel %vm104_vm0, %v909_v11, 0.0 }
 0x6e4   :  { %916 = vadd.xlane.f32.xlu1 %v915_v3 }
 0x74f   :  { %v914_v30 = vpop.xlane.xlu0 %913 }
 0x750   :  { %v918_v31 = vmul.f32 %v914_v30, %v1471_v26 }
 0x752   :  { %v920_v32 = vsub.f32 %v908_v27, %v918_v31 }
 0x754   :  { %v922_v33 = vmul.f32 %v920_v32, %v920_v32 }
 0x756   :  { %v924_v34 = vsel %vm104_vm0, %v922_v33, 0.0 }
 0x757   :  { %v917_v35 = vpop.xlane.xlu1 %916  ;;  %925 = vadd.xlane.f32.xlu0 %v924_v34 }
 0x758   :  { %v919_v62 = vmul.f32 %v917_v35, %v1471_v26 }
 0x75a   :  { %v921_v36 = vsub.f32 %v909_v11, %v919_v62 }
 0x75c   :  { %v923_v37 = vmul.f32 %v921_v36, %v921_v36 }
 0x75e   :  { %v927_v38 = vsel %vm104_vm0, %v923_v37, 0.0 }
 0x75f   :  { %928 = vadd.xlane.f32.xlu1 %v927_v38 }
 0x7ca   :  { %v926_v63 = vpop.xlane.xlu0 %925 }
 0x7cb   :  { %v930_v39 = vmul.f32 %v926_v63, %v1471_v26 }
 0x7cd   :  { %v932_v40 = vadd.f32 1e-05, %v930_v39 }
 0x7cf   :  { %1136 = vrsqrt.f32 %v932_v40  ;;  %vm940_vm10 = vweird.f32 %v932_v40 }
 0x7d2   :  { %v929_v41 = vpop.xlane.xlu1 %928 }
 0x7d3   :  { %v931_v42 = vmul.f32 %v929_v41, %v1471_v26  ;;  %v1089_v26 = vld [vmem:[%s1561_s13] ss:$0 sm:$0xff]  ;;  %s1239_s13 = smov 128  }
 0x7d5   :  { %v1137_v43 = vpop.eup %1136  ;;  %v933_v44 = vadd.f32 1e-05, %v931_v42 }
 0x7d6   :  { %v935_v45 = vmul.f32 %v1137_v43, %v932_v40  ;;  %vm941_vm9 = vweird.f32 %v1137_v43 }
 0x7d7   :  { %1138 = vrsqrt.f32 %v933_v44  ;;  %vm942_vm11 = vmor %vm940_vm10, %vm941_vm9  ;;  %vm950_vm13 = vweird.f32 %v933_v44 }
 0x7d8   :  { %v936_v46 = vmul.f32 %v1137_v43, %v935_v45 }
 0x7da   :  { %v937_v12 = vmul.f32 0.5, %v936_v46 }
 0x7dc   :  { %v938_v47 = vsub.f32 1.5, %v937_v12 }
 0x7dd   :  { %v1139_v48 = vpop.eup %1138 }
 0x7de   :  { %v939_v49 = vmul.f32 %v1137_v43, %v938_v47  ;;  %v945_v50 = vmul.f32 %v1139_v48, %v933_v44  ;;  %vm951_vm12 = vweird.f32 %v1139_v48 }
 0x7df   :  { %vm952_vm14 = vmor %vm950_vm13, %vm951_vm12 }
 0x7e0   :  { %v943_v52 = vsel %vm942_vm11, %v1137_v43, %v939_v49  ;;  %v946_v53 = vmul.f32 %v1139_v48, %v945_v50 }
 0x7e1   :  { %v954_v54 = vmul.f32 %v943_v52, %v920_v32 }
 0x7e2   :  { %v947_v55 = vmul.f32 0.5, %v946_v53 }
 0x7e3   :  { %v959_v56 = vmul.f32 %v1088_v51, %v954_v54 }
 0x7e4   :  { %v948_v57 = vsub.f32 1.5, %v947_v55 }
 0x7e5   :  { %v964_v58 = vadd.f32 %v1089_v26, %v959_v56 }
 0x7e6   :  { %v949_v59 = vmul.f32 %v1139_v48, %v948_v57 }
 0x7e7   :  { %966 = vst.msk [vmem:[#allocation8] sm:$0xff] %vm104_vm0, %v964_v58 }
 0x7e8   :  { %v953_v60 = vsel %vm952_vm14, %v1139_v48, %v949_v59 }
 0x7e9   :  { %v955_v61 = vmul.f32 %v953_v60, %v921_v36 }
 0x7eb   :  { %v960_v0 = vmul.f32 %v1088_v51, %v955_v61 }
 0x7ed   :  { %v965_v1 = vadd.f32 %v1089_v26, %v960_v0 }
 0x7ef   :  { %967 = vst.msk [vmem:[#allocation8 + $0x8] sm:$0xff] %vm104_vm0, %v965_v1 }
 0x7f0   :  { %980 = dma.vmem_to_hbm [thread:$0]  %s973_s8, 256, %s975_s29, [#allocation5], %s1239_s13, %s1239_s13, %s1234_s25  }
 0x7f1   :  { %1216 = dma.done.wait [#allocation5], 256  }
 0x7f2   :  { %1217 = vsyncadd [#allocation5], 4294967040 }
 0x7f3   :  { %985 = vsyncpa [#allocation4], 1 }
 0x7f4   :  { %986 = vsyncpa [#allocation7], 1 }
 0x7f5   :  { %987 = vsyncpa [#allocation5], 1 }

</bundles_post_ra>
